<compile_context>
chip_gen: v7x
topology: tpu7x:2x2x1
jax: 0.10.0
libtpu: 0.0.40
codegen_flags: <defaults>
</compile_context>

<pallas_src>
import functools

import jax
import jax.numpy as jnp
from jax.experimental import pallas as pl
from jax.experimental.pallas import tpu as pltpu

LANE = 128


def _round_up(x, m):
    return (x + m - 1) // m * m


def _vmem_budget_bytes():
    """Per-generation VMEM budget: half of physical capacity as headroom
    (v5e/v6e: 128 MiB physical, v7x: 64 MiB)."""
    try:
        cap = pltpu.get_tpu_info().vmem_capacity_bytes
    except Exception:
        cap = 64 * 1024 * 1024  # conservative (v7x-sized) fallback
    return cap // 2


def _resident_spec(block_shape, index_map):
    """Constant-index operand (weights/biases): single VMEM buffer."""
    try:
        return pl.BlockSpec(block_shape, index_map, pipeline_mode=pl.Buffered(1))
    except TypeError:  # older jax without pipeline_mode kwarg
        return pl.BlockSpec(block_shape, index_map)


# -----------------------------------------------------------------------------
# Fused backbone kernel (one image per grid step):
#   3x3 'same' conv (9 shifted-slice matmuls over C) + bias + ReLU
#   -> global-average-pool (sum; 1/HW pre-folded into head weight)
#   -> linear head + bias.   All math in f32.
# -----------------------------------------------------------------------------
def _classifier_kernel(x_ref, wc_ref, bc_ref, wh_ref, bh_ref, out_ref, *, h, w, c):
    # x_ref : [1, H+2, W+2, C] f32   zero-haloed NHWC image (C on lanes)
    # wc_ref: [9, C, Hp]       f32   conv weight per 3x3 tap (tap-major)
    # bc_ref: [1, Hp]          f32   conv bias   (zero-padded)
    # wh_ref: [Hp, Cp]         f32   head weight (zero-padded, pre-scaled by 1/HW)
    # bh_ref: [1, Cp]          f32   head bias   (zero-padded)
    # out   : [1, 1, Cp]       f32   logits (lane-dense, sliced in the wrapper)
    hp = wc_ref.shape[-1]
    acc = jnp.zeros((h * w, hp), jnp.float32)
    # 3x3 conv as 9 accumulated MXU matmuls on shifted slices of the halo block.
    for tap in range(9):
        dy, dx = tap // 3, tap % 3
        patch = x_ref[0, dy:dy + h, dx:dx + w, :].reshape(h * w, c)    # [HW, C]
        acc = acc + jnp.dot(patch, wc_ref[tap],
                            preferred_element_type=jnp.float32)        # [HW, Hp]

    feat = jnp.maximum(acc + bc_ref[...], 0.0)                         # bias + ReLU
    pooled = jnp.sum(feat, axis=0, keepdims=True)                      # [1, Hp] (sum)
    logits = jnp.dot(pooled, wh_ref[...],
                     preferred_element_type=jnp.float32) + bh_ref[...]
    out_ref[0] = logits.astype(out_ref.dtype)                          # [1, Cp]


def _run_backbone(x_pad, wc, bc, wh, bh, h, w, hidden, num_classes):
    n = x_pad.shape[0]
    c = x_pad.shape[-1]
    hp = wc.shape[-1]
    cp = wh.shape[-1]

    # VMEM budget: haloed image block (double-buffered) + f32 feature map/acc
    # + single-buffered weights + output block.
    per_step_bytes = (2 * (h + 2) * _round_up(w + 2, 8) * LANE * 4
                      + 2 * h * w * hp * 4
                      + (9 * c * hp + hp + hp * cp + cp) * 4
                      + 2 * cp * 4)
    budget = _vmem_budget_bytes()
    if per_step_bytes > budget:
        # TODO(synk): spatially tile the image (haloed row blocks, partial-sum
        # accumulator) once one feature map exceeds the per-generation VMEM
        # budget (matters first on v7x's 64 MiB).
        raise ValueError(
            f"per-image block ({per_step_bytes}B) exceeds VMEM budget ({budget}B)")
    vmem_limit = int(min(max(4 * per_step_bytes, 16 * 1024 * 1024), budget))

    # Advisory cost estimate with the REAL (unpadded) dims.
    flops = 2 * n * h * w * (9 * c) * hidden + 2 * n * hidden * num_classes
    bytes_accessed = (n * (h + 2) * (w + 2) * c * 4
                      + (9 * c * hidden + hidden + hidden * num_classes + num_classes) * 4
                      + n * num_classes * 4)

    kernel = functools.partial(_classifier_kernel, h=h, w=w, c=c)

    # TODO(synk): for batch==1 on v7x the second TensorCore idles; a
    # CORE_PARALLEL spatial split (+ cross-core add of the [1,Hp] partial sums)
    # would recover it.  No effect on v5e/v6e (1 TC).
    return pl.pallas_call(
        kernel,
        out_shape=jax.ShapeDtypeStruct((n, 1, cp), jnp.float32),
        grid_spec=pltpu.PrefetchScalarGridSpec(
            num_scalar_prefetch=0,
            grid=(n,),
            in_specs=[
                pl.BlockSpec((1, h + 2, w + 2, c), lambda b: (b, 0, 0, 0)),
                _resident_spec((9, c, hp), lambda b: (0, 0, 0)),
                _resident_spec((1, hp), lambda b: (0, 0)),
                _resident_spec((hp, cp), lambda b: (0, 0)),
                _resident_spec((1, cp), lambda b: (0, 0)),
            ],
            out_specs=pl.BlockSpec((1, 1, cp), lambda b: (b, 0, 0)),
        ),
        compiler_params=pltpu.CompilerParams(
            dimension_semantics=("parallel",),
            vmem_limit_bytes=vmem_limit),
        cost_estimate=pl.CostEstimate(
            flops=flops, transcendentals=0, bytes_accessed=bytes_accessed),
    )(x_pad, wc, bc, wh, bh)


# -----------------------------------------------------------------------------
# Whole forward (preprocessing + pallas_call) under ONE jit: single image pass
# in HBM (NCHW -> haloed NHWC), 1/HW folded into the head weight.
# -----------------------------------------------------------------------------
@functools.partial(jax.jit, static_argnames=("hidden", "num_classes"))
def _classifier_forward(image_nchw, wc_p, bc_p, wh_p, bh_p, hidden, num_classes):
    n, c, h, w = image_nchw.shape
    x = jnp.transpose(image_nchw, (0, 2, 3, 1)).astype(jnp.float32)   # NHWC
    x_pad = jnp.pad(x, ((0, 0), (1, 1), (1, 1), (0, 0)))              # 3x3 halo
    wh_scaled = wh_p * (1.0 / float(h * w))                           # fold 1/HW
    logits_p = _run_backbone(x_pad, wc_p, bc_p, wh_scaled, bh_p, h, w,
                             hidden, num_classes)                     # [N, 1, Cp]
    return logits_p.reshape(n, -1)[:, :num_classes]


def _reference(x_nchw, wc, bc, wh, bh):
    """Pure-JAX f32 reference of the same backbone (sanity check)."""
    x = jnp.transpose(x_nchw, (0, 2, 3, 1)).astype(jnp.float32)
    n, h, w, c = x.shape
    xp = jnp.pad(x, ((0, 0), (1, 1), (1, 1), (0, 0)))
    cols = [xp[:, dy:dy + h, dx:dx + w, :] for dy in range(3) for dx in range(3)]
    patches = jnp.concatenate(cols, axis=-1).reshape(n, h * w, 9 * c)
    feat = jnp.maximum(jnp.einsum("nsk,kh->nsh", patches, wc) + bc, 0.0)
    pooled = feat.mean(axis=1)
    return pooled @ wh + bh


# -----------------------------------------------------------------------------
# Classifier wrapper (mirrors Classifier._pre_process / forward / _post_process
# in inference mode with losses=None)
# -----------------------------------------------------------------------------
class PallasClassifier:
    def __init__(self, in_channels=4, hidden=32, num_classes=8, key=None):
        if key is None:
            key = jax.random.PRNGKey(0)
        k1, k2, k3, k4 = jax.random.split(key, 4)
        k = 9 * in_channels
        self.in_channels = in_channels
        self.hidden = hidden
        self.num_classes = num_classes

        # f32 master parameters (tap-major im2col layout), also used by the ref.
        self.wc = jax.random.normal(k1, (k, hidden), jnp.float32) / jnp.sqrt(k)
        self.bc = jax.random.normal(k2, (1, hidden), jnp.float32) * 0.01
        self.wh = (jax.random.normal(k3, (hidden, num_classes), jnp.float32)
                   / jnp.sqrt(hidden))
        self.bh = jax.random.normal(k4, (1, num_classes), jnp.float32) * 0.01

        # Kernel copies: hidden / classes zero-padded to 128 lanes (padded rows
        # and cols are zero so real logits stay exact); conv weight stored
        # per-tap [9, C, Hp] for the in-kernel shifted-slice conv; f32 (tiny).
        hp = _round_up(hidden, LANE)
        cp = _round_up(num_classes, LANE)
        self.hp, self.cp = hp, cp
        self.wc_p = (jnp.zeros((9, in_channels, hp), jnp.float32)
                     .at[:, :, :hidden].set(self.wc.reshape(9, in_channels, hidden)))
        self.bc_p = jnp.zeros((1, hp), jnp.float32).at[:, :hidden].set(self.bc)
        self.wh_p = (jnp.zeros((hp, cp), jnp.float32)
                     .at[:hidden, :num_classes].set(self.wh))
        self.bh_p = jnp.zeros((1, cp), jnp.float32).at[:, :num_classes].set(self.bh)

    def _pre_process(self, data, target=None):
        if isinstance(data, dict):
            image = data["img"]
            target = data.get("labels", None)
        else:
            image = data
        return image, target

    def _post_process(self, preds, target):
        if target is None:
            return preds
        # Inference / no losses module configured.
        return (preds, target)

    def backbone(self, image_nchw):
        # TODO(synk): make_backbone_graph / cuda-graph warmup has no TPU
        # equivalent; the jitted pallas_call plays the same role.
        return _classifier_forward(image_nchw, self.wc_p, self.bc_p, self.wh_p,
                                   self.bh_p, hidden=self.hidden,
                                   num_classes=self.num_classes)

    def __call__(self, data, target=None):
        image, target = self._pre_process(data, target)
        preds = self.backbone(image)
        return self._post_process(preds, target)


if __name__ == "__main__":
    key = jax.random.PRNGKey(0)
    k_img, k_params = jax.random.split(key)

    # Small NCHW input consistent with an image classifier: [N, C, H, W]
    x = jax.random.normal(k_img, (2, 4, 16, 16), jnp.float32)

    model = PallasClassifier(in_channels=4, hidden=32, num_classes=8, key=k_params)
    preds = model({"img": x})          # target is None -> returns preds only
    preds = jax.block_until_ready(preds)

    assert preds.shape == (2, 8)
    assert preds.dtype == jnp.float32
    assert bool(jnp.all(jnp.isfinite(preds)))

    # Sanity check vs. pure-JAX f32 reference.
    ref = _reference(x, model.wc, model.bc, model.wh, model.bh)
    assert bool(jnp.allclose(preds, ref, atol=5e-2, rtol=5e-2)), (preds, ref)

    print("KERNEL_OK")
</pallas_src>

<mosaic_0001>
module attributes {stable_mosaic.version = 11 : i64} {
  func.func @_classifier_kernel(%arg0: i32, %arg1: memref<1x18x18x4xf32, #tpu.memory_space<vmem>>, %arg2: memref<9x4x128xf32, #tpu.memory_space<vmem>>, %arg3: memref<1x128xf32, #tpu.memory_space<vmem>>, %arg4: memref<128x128xf32, #tpu.memory_space<vmem>>, %arg5: memref<1x128xf32, #tpu.memory_space<vmem>>, %arg6: memref<1x1x128xf32, #tpu.memory_space<vmem>>) attributes {dimension_semantics = [#tpu.dimension_semantics<parallel>], iteration_bounds = array<i64: 2>, scalar_prefetch = 0 : i64, scratch_operands = 0 : i64, tpu.core_type = #tpu.core_type<tc>, window_params = [{transform_indices = @transform_0, window_bounds = array<i64: 1, 18, 18, 4>}, {pipeline_mode = #tpu.pipeline_mode<synchronous>, transform_indices = @transform_1, window_bounds = array<i64: 9, 4, 128>}, {pipeline_mode = #tpu.pipeline_mode<synchronous>, transform_indices = @transform_2, window_bounds = array<i64: 1, 128>}, {pipeline_mode = #tpu.pipeline_mode<synchronous>, transform_indices = @transform_3, window_bounds = array<i64: 128, 128>}, {pipeline_mode = #tpu.pipeline_mode<synchronous>, transform_indices = @transform_4, window_bounds = array<i64: 1, 128>}, {transform_indices = @transform_5, window_bounds = array<i64: 1, 1, 128>}]} {
    %cst = arith.constant 0.000000e+00 : f32
    %0 = vector.broadcast %cst : f32 to vector<256x128xf32>
    %c0 = arith.constant 0 : index
    %c0_0 = arith.constant 0 : index
    %c0_1 = arith.constant 0 : index
    %c0_2 = arith.constant 0 : index
    %1 = vector.load %arg1[%c0, %c0_0, %c0_1, %c0_2] : memref<1x18x18x4xf32, #tpu.memory_space<vmem>>, vector<1x16x16x4xf32>
    %2 = vector.shape_cast %1 : vector<1x16x16x4xf32> to vector<16x16x4xf32>
    %3 = vector.shape_cast %2 : vector<16x16x4xf32> to vector<256x4xf32>
    %c0_3 = arith.constant 0 : index
    %c0_4 = arith.constant 0 : index
    %c0_5 = arith.constant 0 : index
    %4 = vector.load %arg2[%c0_3, %c0_4, %c0_5] : memref<9x4x128xf32, #tpu.memory_space<vmem>>, vector<1x4x128xf32>
    %5 = vector.shape_cast %4 : vector<1x4x128xf32> to vector<4x128xf32>
    %cst_6 = arith.constant dense<0.000000e+00> : vector<256x128xf32>
    %6 = tpu.matmul %3, %5, %cst_6 {dimension_numbers = #tpu.dot_dimension_numbers<[1], [0], [0], [1], [0, 0, 1, 1], [], []>} : vector<256x4xf32>, vector<4x128xf32>, vector<256x128xf32> -> vector<256x128xf32>
    %7 = arith.addf %0, %6 : vector<256x128xf32>
    %c0_7 = arith.constant 0 : index
    %c0_8 = arith.constant 0 : index
    %c1 = arith.constant 1 : index
    %c0_9 = arith.constant 0 : index
    %8 = vector.load %arg1[%c0_7, %c0_8, %c1, %c0_9] : memref<1x18x18x4xf32, #tpu.memory_space<vmem>>, vector<1x16x16x4xf32>
    %9 = vector.shape_cast %8 : vector<1x16x16x4xf32> to vector<16x16x4xf32>
    %10 = vector.shape_cast %9 : vector<16x16x4xf32> to vector<256x4xf32>
    %c1_10 = arith.constant 1 : index
    %c0_11 = arith.constant 0 : index
    %c0_12 = arith.constant 0 : index
    %11 = vector.load %arg2[%c1_10, %c0_11, %c0_12] : memref<9x4x128xf32, #tpu.memory_space<vmem>>, vector<1x4x128xf32>
    %12 = vector.shape_cast %11 : vector<1x4x128xf32> to vector<4x128xf32>
    %cst_13 = arith.constant dense<0.000000e+00> : vector<256x128xf32>
    %13 = tpu.matmul %10, %12, %cst_13 {dimension_numbers = #tpu.dot_dimension_numbers<[1], [0], [0], [1], [0, 0, 1, 1], [], []>} : vector<256x4xf32>, vector<4x128xf32>, vector<256x128xf32> -> vector<256x128xf32>
    %14 = arith.addf %7, %13 : vector<256x128xf32>
    %c0_14 = arith.constant 0 : index
    %c0_15 = arith.constant 0 : index
    %c2 = arith.constant 2 : index
    %c0_16 = arith.constant 0 : index
    %15 = vector.load %arg1[%c0_14, %c0_15, %c2, %c0_16] : memref<1x18x18x4xf32, #tpu.memory_space<vmem>>, vector<1x16x16x4xf32>
    %16 = vector.shape_cast %15 : vector<1x16x16x4xf32> to vector<16x16x4xf32>
    %17 = vector.shape_cast %16 : vector<16x16x4xf32> to vector<256x4xf32>
    %c2_17 = arith.constant 2 : index
    %c0_18 = arith.constant 0 : index
    %c0_19 = arith.constant 0 : index
    %18 = vector.load %arg2[%c2_17, %c0_18, %c0_19] : memref<9x4x128xf32, #tpu.memory_space<vmem>>, vector<1x4x128xf32>
    %19 = vector.shape_cast %18 : vector<1x4x128xf32> to vector<4x128xf32>
    %cst_20 = arith.constant dense<0.000000e+00> : vector<256x128xf32>
    %20 = tpu.matmul %17, %19, %cst_20 {dimension_numbers = #tpu.dot_dimension_numbers<[1], [0], [0], [1], [0, 0, 1, 1], [], []>} : vector<256x4xf32>, vector<4x128xf32>, vector<256x128xf32> -> vector<256x128xf32>
    %21 = arith.addf %14, %20 : vector<256x128xf32>
    %c0_21 = arith.constant 0 : index
    %c1_22 = arith.constant 1 : index
    %c0_23 = arith.constant 0 : index
    %c0_24 = arith.constant 0 : index
    %22 = vector.load %arg1[%c0_21, %c1_22, %c0_23, %c0_24] : memref<1x18x18x4xf32, #tpu.memory_space<vmem>>, vector<1x16x16x4xf32>
    %23 = vector.shape_cast %22 : vector<1x16x16x4xf32> to vector<16x16x4xf32>
    %24 = vector.shape_cast %23 : vector<16x16x4xf32> to vector<256x4xf32>
    %c3 = arith.constant 3 : index
    %c0_25 = arith.constant 0 : index
    %c0_26 = arith.constant 0 : index
    %25 = vector.load %arg2[%c3, %c0_25, %c0_26] : memref<9x4x128xf32, #tpu.memory_space<vmem>>, vector<1x4x128xf32>
    %26 = vector.shape_cast %25 : vector<1x4x128xf32> to vector<4x128xf32>
    %cst_27 = arith.constant dense<0.000000e+00> : vector<256x128xf32>
    %27 = tpu.matmul %24, %26, %cst_27 {dimension_numbers = #tpu.dot_dimension_numbers<[1], [0], [0], [1], [0, 0, 1, 1], [], []>} : vector<256x4xf32>, vector<4x128xf32>, vector<256x128xf32> -> vector<256x128xf32>
    %28 = arith.addf %21, %27 : vector<256x128xf32>
    %c0_28 = arith.constant 0 : index
    %c1_29 = arith.constant 1 : index
    %c1_30 = arith.constant 1 : index
    %c0_31 = arith.constant 0 : index
    %29 = vector.load %arg1[%c0_28, %c1_29, %c1_30, %c0_31] : memref<1x18x18x4xf32, #tpu.memory_space<vmem>>, vector<1x16x16x4xf32>
    %30 = vector.shape_cast %29 : vector<1x16x16x4xf32> to vector<16x16x4xf32>
    %31 = vector.shape_cast %30 : vector<16x16x4xf32> to vector<256x4xf32>
    %c4 = arith.constant 4 : index
    %c0_32 = arith.constant 0 : index
    %c0_33 = arith.constant 0 : index
    %32 = vector.load %arg2[%c4, %c0_32, %c0_33] : memref<9x4x128xf32, #tpu.memory_space<vmem>>, vector<1x4x128xf32>
    %33 = vector.shape_cast %32 : vector<1x4x128xf32> to vector<4x128xf32>
    %cst_34 = arith.constant dense<0.000000e+00> : vector<256x128xf32>
    %34 = tpu.matmul %31, %33, %cst_34 {dimension_numbers = #tpu.dot_dimension_numbers<[1], [0], [0], [1], [0, 0, 1, 1], [], []>} : vector<256x4xf32>, vector<4x128xf32>, vector<256x128xf32> -> vector<256x128xf32>
    %35 = arith.addf %28, %34 : vector<256x128xf32>
    %c0_35 = arith.constant 0 : index
    %c1_36 = arith.constant 1 : index
    %c2_37 = arith.constant 2 : index
    %c0_38 = arith.constant 0 : index
    %36 = vector.load %arg1[%c0_35, %c1_36, %c2_37, %c0_38] : memref<1x18x18x4xf32, #tpu.memory_space<vmem>>, vector<1x16x16x4xf32>
    %37 = vector.shape_cast %36 : vector<1x16x16x4xf32> to vector<16x16x4xf32>
    %38 = vector.shape_cast %37 : vector<16x16x4xf32> to vector<256x4xf32>
    %c5 = arith.constant 5 : index
    %c0_39 = arith.constant 0 : index
    %c0_40 = arith.constant 0 : index
    %39 = vector.load %arg2[%c5, %c0_39, %c0_40] : memref<9x4x128xf32, #tpu.memory_space<vmem>>, vector<1x4x128xf32>
    %40 = vector.shape_cast %39 : vector<1x4x128xf32> to vector<4x128xf32>
    %cst_41 = arith.constant dense<0.000000e+00> : vector<256x128xf32>
    %41 = tpu.matmul %38, %40, %cst_41 {dimension_numbers = #tpu.dot_dimension_numbers<[1], [0], [0], [1], [0, 0, 1, 1], [], []>} : vector<256x4xf32>, vector<4x128xf32>, vector<256x128xf32> -> vector<256x128xf32>
    %42 = arith.addf %35, %41 : vector<256x128xf32>
    %c0_42 = arith.constant 0 : index
    %c2_43 = arith.constant 2 : index
    %c0_44 = arith.constant 0 : index
    %c0_45 = arith.constant 0 : index
    %43 = vector.load %arg1[%c0_42, %c2_43, %c0_44, %c0_45] : memref<1x18x18x4xf32, #tpu.memory_space<vmem>>, vector<1x16x16x4xf32>
    %44 = vector.shape_cast %43 : vector<1x16x16x4xf32> to vector<16x16x4xf32>
    %45 = vector.shape_cast %44 : vector<16x16x4xf32> to vector<256x4xf32>
    %c6 = arith.constant 6 : index
    %c0_46 = arith.constant 0 : index
    %c0_47 = arith.constant 0 : index
    %46 = vector.load %arg2[%c6, %c0_46, %c0_47] : memref<9x4x128xf32, #tpu.memory_space<vmem>>, vector<1x4x128xf32>
    %47 = vector.shape_cast %46 : vector<1x4x128xf32> to vector<4x128xf32>
    %cst_48 = arith.constant dense<0.000000e+00> : vector<256x128xf32>
    %48 = tpu.matmul %45, %47, %cst_48 {dimension_numbers = #tpu.dot_dimension_numbers<[1], [0], [0], [1], [0, 0, 1, 1], [], []>} : vector<256x4xf32>, vector<4x128xf32>, vector<256x128xf32> -> vector<256x128xf32>
    %49 = arith.addf %42, %48 : vector<256x128xf32>
    %c0_49 = arith.constant 0 : index
    %c2_50 = arith.constant 2 : index
    %c1_51 = arith.constant 1 : index
    %c0_52 = arith.constant 0 : index
    %50 = vector.load %arg1[%c0_49, %c2_50, %c1_51, %c0_52] : memref<1x18x18x4xf32, #tpu.memory_space<vmem>>, vector<1x16x16x4xf32>
    %51 = vector.shape_cast %50 : vector<1x16x16x4xf32> to vector<16x16x4xf32>
    %52 = vector.shape_cast %51 : vector<16x16x4xf32> to vector<256x4xf32>
    %c7 = arith.constant 7 : index
    %c0_53 = arith.constant 0 : index
    %c0_54 = arith.constant 0 : index
    %53 = vector.load %arg2[%c7, %c0_53, %c0_54] : memref<9x4x128xf32, #tpu.memory_space<vmem>>, vector<1x4x128xf32>
    %54 = vector.shape_cast %53 : vector<1x4x128xf32> to vector<4x128xf32>
    %cst_55 = arith.constant dense<0.000000e+00> : vector<256x128xf32>
    %55 = tpu.matmul %52, %54, %cst_55 {dimension_numbers = #tpu.dot_dimension_numbers<[1], [0], [0], [1], [0, 0, 1, 1], [], []>} : vector<256x4xf32>, vector<4x128xf32>, vector<256x128xf32> -> vector<256x128xf32>
    %56 = arith.addf %49, %55 : vector<256x128xf32>
    %c0_56 = arith.constant 0 : index
    %c2_57 = arith.constant 2 : index
    %c2_58 = arith.constant 2 : index
    %c0_59 = arith.constant 0 : index
    %57 = vector.load %arg1[%c0_56, %c2_57, %c2_58, %c0_59] : memref<1x18x18x4xf32, #tpu.memory_space<vmem>>, vector<1x16x16x4xf32>
    %58 = vector.shape_cast %57 : vector<1x16x16x4xf32> to vector<16x16x4xf32>
    %59 = vector.shape_cast %58 : vector<16x16x4xf32> to vector<256x4xf32>
    %c8 = arith.constant 8 : index
    %c0_60 = arith.constant 0 : index
    %c0_61 = arith.constant 0 : index
    %60 = vector.load %arg2[%c8, %c0_60, %c0_61] : memref<9x4x128xf32, #tpu.memory_space<vmem>>, vector<1x4x128xf32>
    %61 = vector.shape_cast %60 : vector<1x4x128xf32> to vector<4x128xf32>
    %cst_62 = arith.constant dense<0.000000e+00> : vector<256x128xf32>
    %62 = tpu.matmul %59, %61, %cst_62 {dimension_numbers = #tpu.dot_dimension_numbers<[1], [0], [0], [1], [0, 0, 1, 1], [], []>} : vector<256x4xf32>, vector<4x128xf32>, vector<256x128xf32> -> vector<256x128xf32>
    %63 = arith.addf %56, %62 : vector<256x128xf32>
    %c0_63 = arith.constant 0 : index
    %c0_64 = arith.constant 0 : index
    %64 = vector.load %arg3[%c0_63, %c0_64] : memref<1x128xf32, #tpu.memory_space<vmem>>, vector<1x128xf32>
    %65 = vector.broadcast %64 : vector<1x128xf32> to vector<256x128xf32>
    %66 = arith.addf %63, %65 : vector<256x128xf32>
    %cst_65 = arith.constant 0.000000e+00 : f32
    %67 = vector.broadcast %cst_65 : f32 to vector<256x128xf32>
    %68 = arith.maximumf %66, %67 : vector<256x128xf32>
    %cst_66 = arith.constant dense<0.000000e+00> : vector<128xf32>
    %69 = vector.multi_reduction <add>, %68, %cst_66 [0] : vector<256x128xf32> to vector<128xf32>
    %70 = vector.shape_cast %69 : vector<128xf32> to vector<1x128xf32>
    %c0_67 = arith.constant 0 : index
    %c0_68 = arith.constant 0 : index
    %71 = vector.load %arg4[%c0_67, %c0_68] : memref<128x128xf32, #tpu.memory_space<vmem>>, vector<128x128xf32>
    %cst_69 = arith.constant dense<0.000000e+00> : vector<1x128xf32>
    %72 = tpu.matmul %70, %71, %cst_69 {dimension_numbers = #tpu.dot_dimension_numbers<[1], [0], [0], [1], [0, 0, 1, 1], [], []>} : vector<1x128xf32>, vector<128x128xf32>, vector<1x128xf32> -> vector<1x128xf32>
    %c0_70 = arith.constant 0 : index
    %c0_71 = arith.constant 0 : index
    %73 = vector.load %arg5[%c0_70, %c0_71] : memref<1x128xf32, #tpu.memory_space<vmem>>, vector<1x128xf32>
    %74 = arith.addf %72, %73 : vector<1x128xf32>
    %c0_72 = arith.constant 0 : index
    %c0_73 = arith.constant 0 : index
    %c0_74 = arith.constant 0 : index
    %75 = vector.load %arg6[%c0_72, %c0_73, %c0_74] : memref<1x1x128xf32, #tpu.memory_space<vmem>>, vector<1x1x128xf32>
    %76 = vector.shape_cast %75 : vector<1x1x128xf32> to vector<1x128xf32>
    %77 = vector.shape_cast %74 : vector<1x128xf32> to vector<1x1x128xf32>
    tpu.vector_store %arg6[%c0_72, %c0_73, %c0_74], %77 {strides = array<i32>} : memref<1x1x128xf32, #tpu.memory_space<vmem>>, vector<1x1x128xf32>,
    return
  }
  func.func @transform_0(%arg0: i32) -> (i32, i32, i32, i32) {
    %c0_i32 = arith.constant 0 : i32
    %c0_i32_0 = arith.constant 0 : i32
    %c0_i32_1 = arith.constant 0 : i32
    %c0_i32_2 = arith.constant 0 : i32
    return %arg0, %c0_i32, %c0_i32_0, %c0_i32_1 : i32, i32, i32, i32
  }
  func.func @transform_1(%arg0: i32) -> (i32, i32, i32) {
    %c0_i32 = arith.constant 0 : i32
    %c0_i32_0 = arith.constant 0 : i32
    %c0_i32_1 = arith.constant 0 : i32
    %c0_i32_2 = arith.constant 0 : i32
    return %c0_i32, %c0_i32_0, %c0_i32_1 : i32, i32, i32
  }
  func.func @transform_2(%arg0: i32) -> (i32, i32) {
    %c0_i32 = arith.constant 0 : i32
    %c0_i32_0 = arith.constant 0 : i32
    %c0_i32_1 = arith.constant 0 : i32
    return %c0_i32, %c0_i32_0 : i32, i32
  }
  func.func @transform_3(%arg0: i32) -> (i32, i32) {
    %c0_i32 = arith.constant 0 : i32
    %c0_i32_0 = arith.constant 0 : i32
    %c0_i32_1 = arith.constant 0 : i32
    return %c0_i32, %c0_i32_0 : i32, i32
  }
  func.func @transform_4(%arg0: i32) -> (i32, i32) {
    %c0_i32 = arith.constant 0 : i32
    %c0_i32_0 = arith.constant 0 : i32
    %c0_i32_1 = arith.constant 0 : i32
    return %c0_i32, %c0_i32_0 : i32, i32
  }
  func.func @transform_5(%arg0: i32) -> (i32, i32, i32) {
    %c0_i32 = arith.constant 0 : i32
    %c0_i32_0 = arith.constant 0 : i32
    %c0_i32_1 = arith.constant 0 : i32
    return %arg0, %c0_i32, %c0_i32_0 : i32, i32, i32
  }
}

</mosaic_0001>

<bundles_post_ra>
// kernel: _classifier_forward.1
= control target key start
LH: loop header
LB: loop body
LE: loop exit
PB: predicated region body
PF: predicated region fallthrough
CT: control target
= control target key end

     0   :  { %10 = vsyncpa [#allocation3], 0  ;;  %s6847_s0 = inlined_call_operand.vmem [shape: f32[2,18,18,4], index: 0, kind: input, shape index: {}]   ;;  %s6848_s1 = inlined_call_operand.vmem [shape: f32[9,4,128], index: 1, kind: input, shape index: {}]   ;;  %s6849_s2 = inlined_call_operand.vmem [shape: f32[1,128], index: 2, kind: input, shape index: {}]   ;;  %s6850_s3 = inlined_call_operand.vmem [shape: f32[128,128], index: 3, kind: input, shape index: {}]   ;;  %s6851_s4 = inlined_call_operand.vmem [shape: f32[1,128], index: 4, kind: input, shape index: {}]   ;;  %s6852_s5 = inlined_call_operand.hbm [shape: f32[2,1,128], index: 5, kind: output, shape index: {}]  }
   0x1   :  { %12 = vsyncpa [#allocation3 + $0x1], 0  ;;  %s5661_s18 = smov 0   ;;  %s5663_s19 = smov 0  }
   0x2   :  { %s5665_s20 = smov 0   ;;  %s5667_s21 = smov 0  }
   0x3 LB: > { %s5682_s22 = sadd.s32 4294967295, %s5625_s21   ;;  %s3935_s23 = sadd.s32 4294967294, %s5625_s21   ;;  %s5625_s21 = sphi %s5667_s21, %s6963_s21   ;;  %s5621_s20 = sphi %s5665_s20, %s6962_s20   ;;  %s5617_s19 = sphi %s5663_s19, %s6961_s19   ;;  %s5613_s18 = sphi %s5661_s18, %s6960_s18  }
   0x4   : > { %s5686_s24 = sadd.s32 1, %s5625_s21   ;;  %s135_s25 = sadd.s32 1, %s5621_s20 }
   0x5   : > { %s132_s26 = ssub.s32 %s5625_s21, %s5686_s24  ;;  %p145_p0 = scmp.ne.s32.totalorder %s5621_s20, %s5617_s19 }
   0x6   : > { %p133_p1 = scmp.eq.s32.totalorder %s132_s26, 0  ;;  %p146_p2 = scmp.eq.s32.totalorder %s5682_s22, 1 }
   0x7   : > { %p151_p3 = scmp.ne.s32.totalorder %s5617_s19, %s5613_s18  ;;  %p152_p4 = scmp.eq.s32.totalorder %s3935_s23, 1 }
   0x8   : > { %s5697_s27 = scalar_select %p133_p1, %s5621_s20, %s135_s25  }
   0x9   : > { %p5699_p5 = por %p146_p2, %p145_p0  ;;  %p5703_p6 = por %p152_p4, %p151_p3 }
   0xa   : > { %p3938_p7 = scmp.ge.s32.totalorder %s5625_s21, 1  ;;  %p190_p8 = scmp.lt.s32.totalorder %s5625_s21, 3 }
   0xc   : > { %p191_p9 = pnand %p3938_p7, %p190_p8 }
   0xe   : > { %194 = sbr.rel (%p191_p9) target bundleno = 809 (0x329), region = 40 }
  0x15   : > { %vm386_vm0 = vcmask 1043456   ;;  %v4139_v0 = vld [vmem:[%s6848_s1 + $0x10] sm:$0xf]  ;;  %v3940_v1 = vld [vmem:[%s6848_s1 + $0x4] sm:$0xf]  ;;  %p217_p10 = scmp.lt.s32.totalorder %s5682_s22, 1 }
  0x16   : > { %4955 = vmatprep.subr.msk.mxu0 %vm386_vm0, %v4139_v0  ;;  %4755 = vmatprep.subr.msk.mxu1 %vm386_vm0, %v3940_v1  ;;  %v4205_v2 = vld [vmem:[%s6848_s1 + $0x14] sm:$0xf]  ;;  %v254_v3 = vld [vmem:[%s6848_s1] sm:$0xf]  ;;  %vm289_vm1 = vcmask 31744   ;;  %vm5628_vm2 = vmmov 0  }
  0x17   : > { %4956 = vmatpush3.msk.msra.mxu0 %vm386_vm0, %v4139_v0  ;;  %4756 = vmatpush3.msk.msra.mxu1 %vm386_vm0, %v3940_v1  ;;  %s218_s13 = scalar_select %p217_p10, %s5682_s22, 1  ;;  %v5748_v9 = vld [vmem:[%s6848_s1 + $0x18] sm:$0xf]  ;;  %v5753_v10 = vld [vmem:[%s6848_s1 + $0x8] sm:$0xf] }
  0x18   : > { %5005 = vmatprep.subr.msk.mxu0 %vm386_vm0, %v4205_v2  ;;  %4805 = vmatprep.subr.msk.mxu1 %vm386_vm0, %v254_v3  ;;  %v5989_v46 = vld [vmem:[%s6848_s1 + $0x1c] sm:$0xf]  ;;  %v5994_v47 = vld [vmem:[%s6848_s1 + $0xc] sm:$0xf]  ;;  %s4438_s23 = sshll.u32 %s5682_s22, 4  ;;  %s5630_s22 = smov [#allocation2]  }
  0x19   : > { %s5520_s14 = smul.u32 432, %s218_s13  ;;  %s6805_s6 = scalar_lea.hbm %s6852_s5, %s4438_s23 }
  0x1a   : > { %s5567_s9 = sshll.u32 %s5630_s22, 4  ;;  %s5568_s9 = int_to_ptr.vmem [resolvable:$false] %s5567_s9 }
  0x1b   : > { %s5732_s17 = scalar_lea.vmem %s6847_s0, %s5520_s14  ;;  %s215_s14 = sand.u32 1, %s5617_s19  }
  0x1c   : > { %v255_v4 = vld [vmem:[%s5732_s17 + $0x1] sm:$0xff]  ;;  %v4107_v5 = vld [vmem:[%s5732_s17 + $0x19] sm:$0xff]  ;;  %v256_v6 = vld [vmem:[%s5732_s17 + $0x9] sm:$0xff]  ;;  %s3868_s7 = scalar_lea.sflag [#allocation3], %s215_s14  ;;  %s5569_s10 = scalar_lea.vmem %s5568_s9, 32 }
  0x1d   : > { %4757 = vmatprep.mubr.msk.f32.mxu1 %vm289_vm1, %v255_v4  ;;  %4957 = vmatprep.mubr.msk.f32.mxu0 %vm289_vm1, %v4107_v5  ;;  %v4108_v7 = vld [vmem:[%s5732_s17 + $0x21] sm:$0xff]  ;;  %v5741_v8 = vld [vmem:[%s5732_s17 + $0x31] sm:$0xff]  ;;  %v5758_v11 = vld [vmem:[%s5732_s17 + $0x39] sm:$0xff] }
  0x1e   : > { %6890 = vst [vmem:[#allocation5_spill] sm:$0xff] %v5741_v8  ;;  %4758 = vmatmul.mubr.msk.f32.vlgmr.msra.gmra.mrb[0].mxu1 %vm289_vm1, %v256_v6  ;;  %4958 = vmatmul.mubr.msk.f32.vlgmr.msra.gmra.mrb[0].mxu0 %vm289_vm1, %v4108_v7  ;;  %6891 = vst [vmem:[#allocation6_spill] sm:$0xff] %v5758_v11  ;;  %v5763_v12 = vld [vmem:[%s5732_s17 + $0x49] sm:$0xff]  ;;  %v5778_v13 = vld [vmem:[%s5732_s17 + $0x51] sm:$0xff] }
  0x1f   : > { %5006 = vmatpush3.msk.msra.mxu0 %vm386_vm0, %v4205_v2  ;;  %4760 = vmatprep.mubr.msk.f32.mxu1 %vm289_vm1, %v4107_v5  ;;  %6892 = vst [vmem:[#allocation7_spill] sm:$0xff] %v5763_v12  ;;  %6893 = vst [vmem:[#allocation8_spill] sm:$0xff] %v5778_v13  ;;  %v5781_v14 = vld [vmem:[%s5732_s17 + $0x61] sm:$0xff]  ;;  %v5792_v15 = vld [vmem:[%s5732_s17 + $0x69] sm:$0xff] }
  0x20   : > { %4960 = vmatprep.mubr.msk.f32.mxu0 %vm289_vm1, %v5741_v8  ;;  %4806 = vmatpush3.msk.msra.mxu1 %vm386_vm0, %v254_v3  ;;  %6894 = vst [vmem:[#allocation9_spill] sm:$0xff] %v5781_v14  ;;  %6895 = vst [vmem:[#allocation10_spill] sm:$0xff] %v5792_v15  ;;  %v5795_v16 = vld [vmem:[%s5732_s17 + $0x79] sm:$0xff]  ;;  %v5806_v17 = vld [vmem:[%s5732_s17 + $0x81] sm:$0xff] }
  0x21   : > { %5055 = vmatprep.subr.msk.mxu0 %vm386_vm0, %v5748_v9  ;;  %4855 = vmatprep.subr.msk.mxu1 %vm386_vm0, %v5753_v10  ;;  %6896 = vst [vmem:[#allocation11_spill] sm:$0xff] %v5795_v16  ;;  %6897 = vst [vmem:[#allocation12_spill] sm:$0xff] %v5806_v17  ;;  %v5809_v18 = vld [vmem:[%s5732_s17 + $0x91] sm:$0xff]  ;;  %v5820_v19 = vld [vmem:[%s5732_s17 + $0x99] sm:$0xff] }
  0x22   : > { %4761 = vmatmul.mubr.msk.f32.gmra.mrb[2].mxu1 %vm289_vm1, %v4108_v7  ;;  %4961 = vmatmul.mubr.msk.f32.gmra.mrb[2].mxu0 %vm289_vm1, %v5758_v11  ;;  %6898 = vst [vmem:[#allocation13_spill] sm:$0xff] %v5809_v18  ;;  %6899 = vst [vmem:[#allocation14_spill] sm:$0xff] %v5820_v19  ;;  %v5823_v20 = vld [vmem:[%s5732_s17 + $0xa9] sm:$0xff]  ;;  %v5834_v21 = vld [vmem:[%s5732_s17 + $0xb1] sm:$0xff] }
  0x23   : > { %4763 = vmatprep.mubr.msk.f32.mxu1 %vm289_vm1, %v5741_v8  ;;  %4963 = vmatprep.mubr.msk.f32.mxu0 %vm289_vm1, %v5763_v12  ;;  %6900 = vst [vmem:[#allocation15_spill] sm:$0xff] %v5823_v20  ;;  %6901 = vst [vmem:[#allocation16_spill] sm:$0xff] %v5834_v21  ;;  %v5837_v22 = vld [vmem:[%s5732_s17 + $0xc1] sm:$0xff]  ;;  %v5848_v23 = vld [vmem:[%s5732_s17 + $0xc9] sm:$0xff] }
  0x24   : > { %6902 = vst [vmem:[#allocation17_spill] sm:$0xff] %v5837_v22  ;;  %6903 = vst [vmem:[#allocation18_spill] sm:$0xff] %v5848_v23  ;;  %v5851_v24 = vld [vmem:[%s5732_s17 + $0xd9] sm:$0xff]  ;;  %v5862_v25 = vld [vmem:[%s5732_s17 + $0xe1] sm:$0xff] }
  0x25   : > { %6904 = vst [vmem:[#allocation19_spill] sm:$0xff] %v5851_v24  ;;  %6905 = vst [vmem:[#allocation20_spill] sm:$0xff] %v5862_v25  ;;  %v5865_v26 = vld [vmem:[%s5732_s17 + $0xf1] sm:$0xff]  ;;  %v5876_v27 = vld [vmem:[%s5732_s17 + $0xf9] sm:$0xff] }
  0x26   : > { %4764 = vmatmul.mubr.msk.f32.gmra.mrb[4].mxu1 %vm289_vm1, %v5758_v11  ;;  %4964 = vmatmul.mubr.msk.f32.gmra.mrb[4].mxu0 %vm289_vm1, %v5778_v13  ;;  %6906 = vst [vmem:[#allocation21_spill] sm:$0xff] %v5865_v26  ;;  %6907 = vst [vmem:[#allocation22_spill] sm:$0xff] %v5876_v27  ;;  %v5879_v28 = vld [vmem:[%s5732_s17 + $0x109] sm:$0xff]  ;;  %v5890_v29 = vld [vmem:[%s5732_s17 + $0x111] sm:$0xff] }
  0x27   : > { %4766 = vmatprep.mubr.msk.f32.mxu1 %vm289_vm1, %v5763_v12  ;;  %4966 = vmatprep.mubr.msk.f32.mxu0 %vm289_vm1, %v5781_v14  ;;  %6908 = vst [vmem:[#allocation23_spill] sm:$0xff] %v5879_v28  ;;  %6909 = vst [vmem:[#allocation24_spill] sm:$0xff] %v5890_v29  ;;  %v5893_v30 = vld [vmem:[%s5732_s17 + $0x121] sm:$0xff]  ;;  %v5904_v31 = vld [vmem:[%s5732_s17 + $0x129] sm:$0xff] }
  0x28   : > { %6910 = vst [vmem:[#allocation25_spill] sm:$0xff] %v5893_v30  ;;  %6911 = vst [vmem:[#allocation26_spill] sm:$0xff] %v5904_v31  ;;  %v5907_v32 = vld [vmem:[%s5732_s17 + $0x139] sm:$0xff]  ;;  %v5918_v33 = vld [vmem:[%s5732_s17 + $0x141] sm:$0xff] }
  0x29   : > { %6912 = vst [vmem:[#allocation27_spill] sm:$0xff] %v5907_v32  ;;  %6913 = vst [vmem:[#allocation28_spill] sm:$0xff] %v5918_v33  ;;  %v5921_v34 = vld [vmem:[%s5732_s17 + $0x151] sm:$0xff]  ;;  %v5932_v35 = vld [vmem:[%s5732_s17 + $0x159] sm:$0xff] }
  0x2a   : > { %4767 = vmatmul.mubr.msk.f32.gmra.mrb[6].mxu1 %vm289_vm1, %v5778_v13  ;;  %4967 = vmatmul.mubr.msk.f32.gmra.mrb[6].mxu0 %vm289_vm1, %v5792_v15  ;;  %6914 = vst [vmem:[#allocation29_spill] sm:$0xff] %v5921_v34  ;;  %6915 = vst [vmem:[#allocation30_spill] sm:$0xff] %v5932_v35  ;;  %v5935_v36 = vld [vmem:[%s5732_s17 + $0x169] sm:$0xff]  ;;  %v5946_v37 = vld [vmem:[%s5732_s17 + $0x171] sm:$0xff] }
  0x2b   : > { %4769 = vmatprep.mubr.msk.f32.mxu1 %vm289_vm1, %v5781_v14  ;;  %4969 = vmatprep.mubr.msk.f32.mxu0 %vm289_vm1, %v5795_v16  ;;  %6916 = vst [vmem:[#allocation31_spill] sm:$0xff] %v5935_v36  ;;  %6917 = vst [vmem:[#allocation32_spill] sm:$0xff] %v5946_v37  ;;  %v5949_v38 = vld [vmem:[%s5732_s17 + $0x181] sm:$0xff]  ;;  %v5960_v39 = vld [vmem:[%s5732_s17 + $0x189] sm:$0xff] }
  0x2c   : > { %6918 = vst [vmem:[#allocation33_spill] sm:$0xff] %v5949_v38  ;;  %6919 = vst [vmem:[#allocation34_spill] sm:$0xff] %v5960_v39  ;;  %v222_v40 = vld [vmem:[%s5732_s17] sm:$0xff]  ;;  %v223_v42 = vld [vmem:[%s5732_s17 + $0x8] sm:$0xff] }
  0x2d   : > { %v5964_v41 = vld [vmem:[%s5732_s17 + $0x1a] sm:$0xff]  ;;  %v5975_v43 = vld [vmem:[%s5732_s17 + $0x22] sm:$0xff]  ;;  %v5981_v45 = vld [vmem:[%s5732_s17 + $0x32] sm:$0xff] }
  0x2e   : > { %4770 = vmatmul.mubr.msk.f32.gmra.mrb[8].mxu1 %vm289_vm1, %v5792_v15  ;;  %4970 = vmatmul.mubr.msk.f32.gmra.mrb[8].mxu0 %vm289_vm1, %v5806_v17  ;;  %v5978_v44 = vld [vmem:[%s5732_s17 + $0x18] sm:$0xff]  ;;  %v6001_v48 = vld [vmem:[%s5732_s17 + $0x20] sm:$0xff]  ;;  %v6009_v50 = vld [vmem:[%s5732_s17 + $0x30] sm:$0xff] }
  0x2f   : > { %4772 = vmatprep.mubr.msk.f32.mxu1 %vm289_vm1, %v5795_v16  ;;  %4972 = vmatprep.mubr.msk.f32.mxu0 %vm289_vm1, %v5809_v18  ;;  %6920 = vst [vmem:[#allocation35_spill] sm:$0xff] %v5978_v44  ;;  %6921 = vst [vmem:[#allocation36_spill] sm:$0xff] %v6001_v48  ;;  %v6004_v49 = vld [vmem:[%s5732_s17 + $0x3a] sm:$0xff]  ;;  %v6012_v51 = vld [vmem:[%s5732_s17 + $0x4a] sm:$0xff] }
  0x30   : > { %v6029_v52 = vld [vmem:[%s5732_s17 + $0x38] sm:$0xff]  ;;  %v6035_v54 = vld [vmem:[%s5732_s17 + $0x48] sm:$0xff]  ;;  %v6049_v56 = vld [vmem:[%s5732_s17 + $0x50] sm:$0xff] }
  0x31   : > { %v6032_v53 = vld [vmem:[%s5732_s17 + $0x52] sm:$0xff]  ;;  %v6038_v55 = vld [vmem:[%s5732_s17 + $0x62] sm:$0xff]  ;;  %v6052_v57 = vld [vmem:[%s5732_s17 + $0x6a] sm:$0xff] }
  0x32   : > { %4773 = vmatmul.mubr.msk.f32.gmra.mrb[10].mxu1 %vm289_vm1, %v5806_v17  ;;  %4973 = vmatmul.mubr.msk.f32.gmra.mrb[10].mxu0 %vm289_vm1, %v5820_v19  ;;  %v6055_v58 = vld [vmem:[%s5732_s17 + $0x60] sm:$0xff]  ;;  %v6069_v60 = vld [vmem:[%s5732_s17 + $0x68] sm:$0xff]  ;;  %v6075_v62 = vld [vmem:[%s5732_s17 + $0x78] sm:$0xff] }
  0x33   : > { %4775 = vmatprep.mubr.msk.f32.mxu1 %vm289_vm1, %v5809_v18  ;;  %4975 = vmatprep.mubr.msk.f32.mxu0 %vm289_vm1, %v5823_v20  ;;  %v6058_v59 = vld [vmem:[%s5732_s17 + $0x7a] sm:$0xff]  ;;  %v6072_v61 = vld [vmem:[%s5732_s17 + $0x82] sm:$0xff]  ;;  %v6078_v63 = vld [vmem:[%s5732_s17 + $0x92] sm:$0xff] }
  0x34   : > { %v6089_v0 = vld [vmem:[%s5732_s17 + $0x80] sm:$0xff]  ;;  %v6095_v2 = vld [vmem:[%s5732_s17 + $0x90] sm:$0xff]  ;;  %v6109_v4 = vld [vmem:[%s5732_s17 + $0x98] sm:$0xff] }
  0x35   : > { %v6092_v1 = vld [vmem:[%s5732_s17 + $0x9a] sm:$0xff]  ;;  %v6098_v3 = vld [vmem:[%s5732_s17 + $0xaa] sm:$0xff]  ;;  %v6112_v5 = vld [vmem:[%s5732_s17 + $0xb2] sm:$0xff] }
  0x36   : > { %4776 = vmatmul.mubr.msk.f32.gmra.mrb[12].mxu1 %vm289_vm1, %v5820_v19  ;;  %4976 = vmatmul.mubr.msk.f32.gmra.mrb[12].mxu0 %vm289_vm1, %v5834_v21  ;;  %v6115_v6 = vld [vmem:[%s5732_s17 + $0xa8] sm:$0xff]  ;;  %v6249_v19 = vld [vmem:[%s5732_s17 + $0x140] sm:$0xff]  ;;  %v6255_v17 = vld [vmem:[%s5732_s17 + $0x150] sm:$0xff] }
  0x37   : > { %4778 = vmatprep.mubr.msk.f32.mxu1 %vm289_vm1, %v5823_v20  ;;  %4978 = vmatprep.mubr.msk.f32.mxu0 %vm289_vm1, %v5837_v22  ;;  %v6118_v7 = vld [vmem:[%s5732_s17 + $0xc2] sm:$0xff]  ;;  %v6238_v20 = vld [vmem:[%s5732_s17 + $0x152] sm:$0xff]  ;;  %v6252_v18 = vld [vmem:[%s5732_s17 + $0x15a] sm:$0xff] }
  0x38   : > { %6922 = vst [vmem:[#allocation37_spill] sm:$0xff] %v6252_v18  ;;  %v6258_v16 = vld [vmem:[%s5732_s17 + $0x16a] sm:$0xff]  ;;  %v6269_v15 = vld [vmem:[%s5732_s17 + $0x158] sm:$0xff]  ;;  %v6278_v12 = vld [vmem:[%s5732_s17 + $0x182] sm:$0xff] }
  0x39   : > { %v6272_v14 = vld [vmem:[%s5732_s17 + $0x172] sm:$0xff]  ;;  %v6275_v13 = vld [vmem:[%s5732_s17 + $0x168] sm:$0xff]  ;;  %6923 = vst [vmem:[#allocation38_spill] sm:$0xff] %v6278_v12 }
  0x3a   : > { %4779 = vmatmul.mubr.msk.f32.gmra.mrb[14].mxu1 %vm289_vm1, %v5834_v21  ;;  %4979 = vmatmul.mubr.msk.f32.gmra.mrb[14].mxu0 %vm289_vm1, %v5848_v23  ;;  %v6235_v21 = vld [vmem:[%s5732_s17 + $0x138] sm:$0xff]  ;;  %v6289_v11 = vld [vmem:[%s5732_s17 + $0x170] sm:$0xff]  ;;  %v939_v8 = vld [vmem:[%s5732_s17 + $0x2] sm:$0xff] }
  0x3b   : > { %4781 = vmatprep.mubr.msk.f32.mxu1 %vm289_vm1, %v5837_v22  ;;  %4981 = vmatprep.mubr.msk.f32.mxu0 %vm289_vm1, %v5851_v24  ;;  %v6232_v22 = vld [vmem:[%s5732_s17 + $0x142] sm:$0xff] }
  0x3e   : > { %4782 = vmatmul.mubr.msk.f32.gmra.mrb[16].mxu1 %vm289_vm1, %v5848_v23  ;;  %4982 = vmatmul.mubr.msk.f32.gmra.mrb[16].mxu0 %vm289_vm1, %v5862_v25  ;;  %v6229_v23 = vld [vmem:[%s5732_s17 + $0x128] sm:$0xff] }
  0x3f   : > { %4784 = vmatprep.mubr.msk.f32.mxu1 %vm289_vm1, %v5851_v24  ;;  %4984 = vmatprep.mubr.msk.f32.mxu0 %vm289_vm1, %v5865_v26  ;;  %v6218_v24 = vld [vmem:[%s5732_s17 + $0x13a] sm:$0xff] }
  0x42   : > { %4785 = vmatmul.mubr.msk.f32.gmra.mrb[18].mxu1 %vm289_vm1, %v5862_v25  ;;  %4985 = vmatmul.mubr.msk.f32.gmra.mrb[18].mxu0 %vm289_vm1, %v5876_v27  ;;  %v6215_v25 = vld [vmem:[%s5732_s17 + $0x120] sm:$0xff] }
  0x43   : > { %4787 = vmatprep.mubr.msk.f32.mxu1 %vm289_vm1, %v5865_v26  ;;  %4987 = vmatprep.mubr.msk.f32.mxu0 %vm289_vm1, %v5879_v28  ;;  %v6212_v26 = vld [vmem:[%s5732_s17 + $0x12a] sm:$0xff] }
  0x46   : > { %4788 = vmatmul.mubr.msk.f32.gmra.mrb[20].mxu1 %vm289_vm1, %v5876_v27  ;;  %4988 = vmatmul.mubr.msk.f32.gmra.mrb[20].mxu0 %vm289_vm1, %v5890_v29  ;;  %v6209_v27 = vld [vmem:[%s5732_s17 + $0x110] sm:$0xff] }
  0x47   : > { %4790 = vmatprep.mubr.msk.f32.mxu1 %vm289_vm1, %v5879_v28  ;;  %4990 = vmatprep.mubr.msk.f32.mxu0 %vm289_vm1, %v5893_v30  ;;  %v6198_v28 = vld [vmem:[%s5732_s17 + $0x122] sm:$0xff] }
  0x4a   : > { %4791 = vmatmul.mubr.msk.f32.gmra.mrb[22].mxu1 %vm289_vm1, %v5890_v29  ;;  %4991 = vmatmul.mubr.msk.f32.gmra.mrb[22].mxu0 %vm289_vm1, %v5904_v31  ;;  %v6195_v29 = vld [vmem:[%s5732_s17 + $0x108] sm:$0xff] }
  0x4b   : > { %4793 = vmatprep.mubr.msk.f32.mxu1 %vm289_vm1, %v5893_v30  ;;  %4993 = vmatprep.mubr.msk.f32.mxu0 %vm289_vm1, %v5907_v32  ;;  %v6192_v30 = vld [vmem:[%s5732_s17 + $0x112] sm:$0xff] }
  0x4e   : > { %4794 = vmatmul.mubr.msk.f32.gmra.mrb[24].mxu1 %vm289_vm1, %v5904_v31  ;;  %4994 = vmatmul.mubr.msk.f32.gmra.mrb[24].mxu0 %vm289_vm1, %v5918_v33  ;;  %v6189_v31 = vld [vmem:[%s5732_s17 + $0xf8] sm:$0xff] }
  0x4f   : > { %4796 = vmatprep.mubr.msk.f32.mxu1 %vm289_vm1, %v5907_v32  ;;  %4996 = vmatprep.mubr.msk.f32.mxu0 %vm289_vm1, %v5921_v34  ;;  %v6178_v32 = vld [vmem:[%s5732_s17 + $0x10a] sm:$0xff] }
  0x52   : > { %4797 = vmatmul.mubr.msk.f32.gmra.mrb[26].mxu1 %vm289_vm1, %v5918_v33  ;;  %4997 = vmatmul.mubr.msk.f32.gmra.mrb[26].mxu0 %vm289_vm1, %v5932_v35  ;;  %v6175_v33 = vld [vmem:[%s5732_s17 + $0xf0] sm:$0xff] }
  0x53   : > { %4799 = vmatprep.mubr.msk.f32.mxu1 %vm289_vm1, %v5921_v34  ;;  %4999 = vmatprep.mubr.msk.f32.mxu0 %vm289_vm1, %v5935_v36  ;;  %v6172_v34 = vld [vmem:[%s5732_s17 + $0xfa] sm:$0xff] }
  0x56   : > { %4800 = vmatmul.mubr.msk.f32.gmra.mrb[28].mxu1 %vm289_vm1, %v5932_v35  ;;  %5000 = vmatmul.mubr.msk.f32.gmra.mrb[28].mxu0 %vm289_vm1, %v5946_v37  ;;  %v6169_v35 = vld [vmem:[%s5732_s17 + $0xe0] sm:$0xff] }
  0x57   : > { %4802 = vmatprep.mubr.msk.f32.mxu1 %vm289_vm1, %v5935_v36  ;;  %5002 = vmatprep.mubr.msk.f32.mxu0 %vm289_vm1, %v5949_v38  ;;  %v6152_v38 = vld [vmem:[%s5732_s17 + $0xe2] sm:$0xff]  ;;  %v6158_v36 = vld [vmem:[%s5732_s17 + $0xf2] sm:$0xff] }
  0x5a   : > { %4803 = vmatmul.mubr.msk.f32.gmra.mrb[30].mxu1 %vm289_vm1, %v5946_v37  ;;  %5003 = vmatmul.mubr.msk.f32.gmra.mrb[30].mxu0 %vm289_vm1, %v5960_v39  ;;  %v6149_v39 = vld [vmem:[%s5732_s17 + $0xc8] sm:$0xff]  ;;  %v6155_v37 = vld [vmem:[%s5732_s17 + $0xd8] sm:$0xff] }
  0x5b   : > { %4807 = vmatprep.mubr.msk.f32.mxu1 %vm289_vm1, %v222_v40  ;;  %5007 = vmatprep.mubr.msk.f32.mxu0 %vm289_vm1, %v5964_v41  ;;  %v6135_v40 = vld [vmem:[%s5732_s17 + $0xc0] sm:$0xff] }
  0x5e   : > { %4808 = vmatmul.mubr.msk.f32.vlgmr.msra.gmra.mrb[0].mxu1 %vm289_vm1, %v223_v42  ;;  %5008 = vmatmul.mubr.msk.f32.vlgmr.msra.gmra.mrb[0].mxu0 %vm289_vm1, %v5975_v43  ;;  %v6138_v42 = vld [vmem:[%s5732_s17 + $0xda] sm:$0xff] }
  0x5f   : > { %5056 = vmatpush3.msk.msra.mxu0 %vm386_vm0, %v5748_v9  ;;  %4810 = vmatprep.mubr.msk.f32.mxu1 %vm289_vm1, %v5978_v44  ;;  %v6129_v9 = vld [vmem:[%s5732_s17 + $0xb0] sm:$0xff] }
  0x60   : > { %5010 = vmatprep.mubr.msk.f32.mxu0 %vm289_vm1, %v5981_v45  ;;  %4856 = vmatpush3.msk.msra.mxu1 %vm386_vm0, %v5753_v10  ;;  %v6132_v10 = vld [vmem:[%s5732_s17 + $0xca] sm:$0xff] }
  0x61   : > { %5105 = vmatprep.subr.msk.mxu0 %vm386_vm0, %v5989_v46  ;;  %4905 = vmatprep.subr.msk.mxu1 %vm386_vm0, %v5994_v47  ;;  %v940_v44 = vld [vmem:[%s5732_s17 + $0xa] sm:$0xff] }
  0x62   : > { %4811 = vmatmul.mubr.msk.f32.gmra.mrb[2].mxu1 %vm289_vm1, %v6001_v48  ;;  %5011 = vmatmul.mubr.msk.f32.gmra.mrb[2].mxu0 %vm289_vm1, %v6004_v49  ;;  %v6292_v48 = vld [vmem:[%s5732_s17 + $0x18a] sm:$0xff] }
  0x63   : > { %4813 = vmatprep.mubr.msk.f32.mxu1 %vm289_vm1, %v6009_v50  ;;  %5013 = vmatprep.mubr.msk.f32.mxu0 %vm289_vm1, %v6012_v51  ;;  %6924 = vst [vmem:[#allocation39_spill] sm:$0xff] %v6292_v48 }
  0x66   : > { %4814 = vmatmul.mubr.msk.f32.gmra.mrb[4].mxu1 %vm289_vm1, %v6029_v52  ;;  %5014 = vmatmul.mubr.msk.f32.gmra.mrb[4].mxu0 %vm289_vm1, %v6032_v53 }
  0x67   : > { %4816 = vmatprep.mubr.msk.f32.mxu1 %vm289_vm1, %v6035_v54  ;;  %5016 = vmatprep.mubr.msk.f32.mxu0 %vm289_vm1, %v6038_v55 }
  0x6a   : > { %4817 = vmatmul.mubr.msk.f32.gmra.mrb[6].mxu1 %vm289_vm1, %v6049_v56  ;;  %5017 = vmatmul.mubr.msk.f32.gmra.mrb[6].mxu0 %vm289_vm1, %v6052_v57 }
  0x6b   : > { %4819 = vmatprep.mubr.msk.f32.mxu1 %vm289_vm1, %v6055_v58  ;;  %5019 = vmatprep.mubr.msk.f32.mxu0 %vm289_vm1, %v6058_v59 }
  0x6e   : > { %4820 = vmatmul.mubr.msk.f32.gmra.mrb[8].mxu1 %vm289_vm1, %v6069_v60  ;;  %5020 = vmatmul.mubr.msk.f32.gmra.mrb[8].mxu0 %vm289_vm1, %v6072_v61 }
  0x6f   : > { %4822 = vmatprep.mubr.msk.f32.mxu1 %vm289_vm1, %v6075_v62  ;;  %5022 = vmatprep.mubr.msk.f32.mxu0 %vm289_vm1, %v6078_v63 }
  0x72   : > { %4823 = vmatmul.mubr.msk.f32.gmra.mrb[10].mxu1 %vm289_vm1, %v6089_v0  ;;  %5023 = vmatmul.mubr.msk.f32.gmra.mrb[10].mxu0 %vm289_vm1, %v6092_v1 }
  0x73   : > { %4825 = vmatprep.mubr.msk.f32.mxu1 %vm289_vm1, %v6095_v2  ;;  %5025 = vmatprep.mubr.msk.f32.mxu0 %vm289_vm1, %v6098_v3 }
  0x76   : > { %4826 = vmatmul.mubr.msk.f32.gmra.mrb[12].mxu1 %vm289_vm1, %v6109_v4  ;;  %5026 = vmatmul.mubr.msk.f32.gmra.mrb[12].mxu0 %vm289_vm1, %v6112_v5 }
  0x77   : > { %4828 = vmatprep.mubr.msk.f32.mxu1 %vm289_vm1, %v6115_v6  ;;  %5028 = vmatprep.mubr.msk.f32.mxu0 %vm289_vm1, %v6118_v7 }
  0x7a   : > { %4829 = vmatmul.mubr.msk.f32.gmra.mrb[14].mxu1 %vm289_vm1, %v6129_v9  ;;  %5029 = vmatmul.mubr.msk.f32.gmra.mrb[14].mxu0 %vm289_vm1, %v6132_v10 }
  0x7b   : > { %4831 = vmatprep.mubr.msk.f32.mxu1 %vm289_vm1, %v6135_v40  ;;  %5031 = vmatprep.mubr.msk.f32.mxu0 %vm289_vm1, %v6138_v42 }
  0x7e   : > { %4832 = vmatmul.mubr.msk.f32.gmra.mrb[16].mxu1 %vm289_vm1, %v6149_v39  ;;  %5032 = vmatmul.mubr.msk.f32.gmra.mrb[16].mxu0 %vm289_vm1, %v6152_v38 }
  0x7f   : > { %4834 = vmatprep.mubr.msk.f32.mxu1 %vm289_vm1, %v6155_v37  ;;  %5034 = vmatprep.mubr.msk.f32.mxu0 %vm289_vm1, %v6158_v36 }
  0x82   : > { %4835 = vmatmul.mubr.msk.f32.gmra.mrb[18].mxu1 %vm289_vm1, %v6169_v35  ;;  %5035 = vmatmul.mubr.msk.f32.gmra.mrb[18].mxu0 %vm289_vm1, %v6172_v34 }
  0x83   : > { %4837 = vmatprep.mubr.msk.f32.mxu1 %vm289_vm1, %v6175_v33  ;;  %5037 = vmatprep.mubr.msk.f32.mxu0 %vm289_vm1, %v6178_v32 }
  0x86   : > { %4838 = vmatmul.mubr.msk.f32.gmra.mrb[20].mxu1 %vm289_vm1, %v6189_v31  ;;  %5038 = vmatmul.mubr.msk.f32.gmra.mrb[20].mxu0 %vm289_vm1, %v6192_v30 }
  0x87   : > { %4840 = vmatprep.mubr.msk.f32.mxu1 %vm289_vm1, %v6195_v29  ;;  %5040 = vmatprep.mubr.msk.f32.mxu0 %vm289_vm1, %v6198_v28 }
  0x8a   : > { %4841 = vmatmul.mubr.msk.f32.gmra.mrb[22].mxu1 %vm289_vm1, %v6209_v27  ;;  %5041 = vmatmul.mubr.msk.f32.gmra.mrb[22].mxu0 %vm289_vm1, %v6212_v26 }
  0x8b   : > { %4843 = vmatprep.mubr.msk.f32.mxu1 %vm289_vm1, %v6215_v25  ;;  %5043 = vmatprep.mubr.msk.f32.mxu0 %vm289_vm1, %v6218_v24 }
  0x8e   : > { %4844 = vmatmul.mubr.msk.f32.gmra.mrb[24].mxu1 %vm289_vm1, %v6229_v23  ;;  %5044 = vmatmul.mubr.msk.f32.gmra.mrb[24].mxu0 %vm289_vm1, %v6232_v22 }
  0x8f   : > { %4846 = vmatprep.mubr.msk.f32.mxu1 %vm289_vm1, %v6235_v21  ;;  %5046 = vmatprep.mubr.msk.f32.mxu0 %vm289_vm1, %v6238_v20 }
  0x92   : > { %4847 = vmatmul.mubr.msk.f32.gmra.mrb[26].mxu1 %vm289_vm1, %v6249_v19  ;;  %5047 = vmatmul.mubr.msk.f32.gmra.mrb[26].mxu0 %vm289_vm1, %v6252_v18 }
  0x93   : > { %4849 = vmatprep.mubr.msk.f32.mxu1 %vm289_vm1, %v6255_v17  ;;  %5049 = vmatprep.mubr.msk.f32.mxu0 %vm289_vm1, %v6258_v16 }
  0x96   : > { %4850 = vmatmul.mubr.msk.f32.gmra.mrb[28].mxu1 %vm289_vm1, %v6269_v15  ;;  %5050 = vmatmul.mubr.msk.f32.gmra.mrb[28].mxu0 %vm289_vm1, %v6272_v14 }
  0x97   : > { %4852 = vmatprep.mubr.msk.f32.mxu1 %vm289_vm1, %v6275_v13  ;;  %5052 = vmatprep.mubr.msk.f32.mxu0 %vm289_vm1, %v6278_v12  ;;  %v6309_v12 = vld [vmem:[%s6848_s1 + $0x20] sm:$0xf] }
  0x9a   : > { %4853 = vmatmul.mubr.msk.f32.gmra.mrb[30].mxu1 %vm289_vm1, %v6289_v11  ;;  %5053 = vmatmul.mubr.msk.f32.gmra.mrb[30].mxu0 %vm289_vm1, %v6292_v48  ;;  %v6927_v48 = vld [vmem:[#allocation36_spill] sm:$0xff] }
  0x9b   : > { %4857 = vmatprep.mubr.msk.f32.mxu1 %vm289_vm1, %v939_v8  ;;  %5057 = vmatprep.mubr.msk.f32.mxu0 %vm289_vm1, %v6009_v50  ;;  %v6418_v8 = vld [vmem:[%s5732_s17 + $0x180] sm:$0xff] }
  0x9e   : > { %4858 = vmatmul.mubr.msk.f32.vlgmr.msra.gmra.mrb[0].mxu1 %vm289_vm1, %v940_v44  ;;  %5058 = vmatmul.mubr.msk.f32.vlgmr.msra.gmra.mrb[0].mxu0 %vm289_vm1, %v6029_v52  ;;  %v4270_v44 = vld [vmem:[%s5732_s17 + $0x1a0] sm:$0xff] }
  0x9f   : > { %5106 = vmatpush3.msk.msra.mxu0 %vm386_vm0, %v5989_v46  ;;  %4860 = vmatprep.mubr.msk.f32.mxu1 %vm289_vm1, %v5964_v41  ;;  %v6429_v41 = vld [vmem:[%s5732_s17 + $0x188] sm:$0xff]  ;;  %v6925_v46 = vld [vmem:[#allocation35_spill] sm:$0xff] }
  0xa0   : > { %5060 = vmatprep.mubr.msk.f32.mxu0 %vm289_vm1, %v6035_v54  ;;  %4906 = vmatpush3.msk.msra.mxu1 %vm386_vm0, %v5994_v47  ;;  %v6926_v47 = vld [vmem:[#allocation5_spill] sm:$0xff] }
  0xa1   : > { %5155 = vmatprep.subr.msk.mxu0 %vm386_vm0, %v6309_v12 }
  0xa2   : > { %4861 = vmatmul.mubr.msk.f32.gmra.mrb[2].mxu1 %vm289_vm1, %v5975_v43  ;;  %5061 = vmatmul.mubr.msk.f32.gmra.mrb[2].mxu0 %vm289_vm1, %v6049_v56  ;;  %v4269_v43 = vld [vmem:[%s5732_s17 + $0x198] sm:$0xff] }
  0xa3   : > { %4863 = vmatprep.mubr.msk.f32.mxu1 %vm289_vm1, %v5981_v45  ;;  %5063 = vmatprep.mubr.msk.f32.mxu0 %vm289_vm1, %v6055_v58 }
  0xa6   : > { %4864 = vmatmul.mubr.msk.f32.gmra.mrb[4].mxu1 %vm289_vm1, %v6004_v49  ;;  %5064 = vmatmul.mubr.msk.f32.gmra.mrb[4].mxu0 %vm289_vm1, %v6069_v60 }
  0xa7   : > { %4866 = vmatprep.mubr.msk.f32.mxu1 %vm289_vm1, %v6012_v51  ;;  %5066 = vmatprep.mubr.msk.f32.mxu0 %vm289_vm1, %v6075_v62 }
  0xaa   : > { %4867 = vmatmul.mubr.msk.f32.gmra.mrb[6].mxu1 %vm289_vm1, %v6032_v53  ;;  %5067 = vmatmul.mubr.msk.f32.gmra.mrb[6].mxu0 %vm289_vm1, %v6089_v0 }
  0xab   : > { %4869 = vmatprep.mubr.msk.f32.mxu1 %vm289_vm1, %v6038_v55  ;;  %5069 = vmatprep.mubr.msk.f32.mxu0 %vm289_vm1, %v6095_v2 }
  0xae   : > { %4870 = vmatmul.mubr.msk.f32.gmra.mrb[8].mxu1 %vm289_vm1, %v6052_v57  ;;  %5070 = vmatmul.mubr.msk.f32.gmra.mrb[8].mxu0 %vm289_vm1, %v6109_v4 }
  0xaf   : > { %4872 = vmatprep.mubr.msk.f32.mxu1 %vm289_vm1, %v6058_v59  ;;  %5072 = vmatprep.mubr.msk.f32.mxu0 %vm289_vm1, %v6115_v6 }
  0xb2   : > { %4873 = vmatmul.mubr.msk.f32.gmra.mrb[10].mxu1 %vm289_vm1, %v6072_v61  ;;  %5073 = vmatmul.mubr.msk.f32.gmra.mrb[10].mxu0 %vm289_vm1, %v6129_v9 }
  0xb3   : > { %4875 = vmatprep.mubr.msk.f32.mxu1 %vm289_vm1, %v6078_v63  ;;  %5075 = vmatprep.mubr.msk.f32.mxu0 %vm289_vm1, %v6135_v40 }
  0xb6   : > { %4876 = vmatmul.mubr.msk.f32.gmra.mrb[12].mxu1 %vm289_vm1, %v6092_v1  ;;  %5076 = vmatmul.mubr.msk.f32.gmra.mrb[12].mxu0 %vm289_vm1, %v6149_v39 }
  0xb7   : > { %4878 = vmatprep.mubr.msk.f32.mxu1 %vm289_vm1, %v6098_v3  ;;  %5078 = vmatprep.mubr.msk.f32.mxu0 %vm289_vm1, %v6155_v37 }
  0xba   : > { %4879 = vmatmul.mubr.msk.f32.gmra.mrb[14].mxu1 %vm289_vm1, %v6112_v5  ;;  %5079 = vmatmul.mubr.msk.f32.gmra.mrb[14].mxu0 %vm289_vm1, %v6169_v35 }
  0xbb   : > { %4881 = vmatprep.mubr.msk.f32.mxu1 %vm289_vm1, %v6118_v7  ;;  %5081 = vmatprep.mubr.msk.f32.mxu0 %vm289_vm1, %v6175_v33 }
  0xbe   : > { %4882 = vmatmul.mubr.msk.f32.gmra.mrb[16].mxu1 %vm289_vm1, %v6132_v10  ;;  %5082 = vmatmul.mubr.msk.f32.gmra.mrb[16].mxu0 %vm289_vm1, %v6189_v31 }
  0xbf   : > { %4884 = vmatprep.mubr.msk.f32.mxu1 %vm289_vm1, %v6138_v42  ;;  %5084 = vmatprep.mubr.msk.f32.mxu0 %vm289_vm1, %v6195_v29 }
  0xc2   : > { %4885 = vmatmul.mubr.msk.f32.gmra.mrb[18].mxu1 %vm289_vm1, %v6152_v38  ;;  %5085 = vmatmul.mubr.msk.f32.gmra.mrb[18].mxu0 %vm289_vm1, %v6209_v27 }
  0xc3   : > { %4887 = vmatprep.mubr.msk.f32.mxu1 %vm289_vm1, %v6158_v36  ;;  %5087 = vmatprep.mubr.msk.f32.mxu0 %vm289_vm1, %v6215_v25 }
  0xc6   : > { %4888 = vmatmul.mubr.msk.f32.gmra.mrb[20].mxu1 %vm289_vm1, %v6172_v34  ;;  %5088 = vmatmul.mubr.msk.f32.gmra.mrb[20].mxu0 %vm289_vm1, %v6229_v23 }
  0xc7   : > { %4890 = vmatprep.mubr.msk.f32.mxu1 %vm289_vm1, %v6178_v32  ;;  %5090 = vmatprep.mubr.msk.f32.mxu0 %vm289_vm1, %v6235_v21 }
  0xca   : > { %4891 = vmatmul.mubr.msk.f32.gmra.mrb[22].mxu1 %vm289_vm1, %v6192_v30  ;;  %5091 = vmatmul.mubr.msk.f32.gmra.mrb[22].mxu0 %vm289_vm1, %v6249_v19 }
  0xcb   : > { %4893 = vmatprep.mubr.msk.f32.mxu1 %vm289_vm1, %v6198_v28  ;;  %5093 = vmatprep.mubr.msk.f32.mxu0 %vm289_vm1, %v6255_v17 }
  0xce   : > { %4894 = vmatmul.mubr.msk.f32.gmra.mrb[24].mxu1 %vm289_vm1, %v6212_v26  ;;  %5094 = vmatmul.mubr.msk.f32.gmra.mrb[24].mxu0 %vm289_vm1, %v6269_v15 }
  0xcf   : > { %4896 = vmatprep.mubr.msk.f32.mxu1 %vm289_vm1, %v6218_v24  ;;  %5096 = vmatprep.mubr.msk.f32.mxu0 %vm289_vm1, %v6275_v13 }
  0xd2   : > { %4897 = vmatmul.mubr.msk.f32.gmra.mrb[26].mxu1 %vm289_vm1, %v6232_v22  ;;  %5097 = vmatmul.mubr.msk.f32.gmra.mrb[26].mxu0 %vm289_vm1, %v6289_v11 }
  0xd3   : > { %4899 = vmatprep.mubr.msk.f32.mxu1 %vm289_vm1, %v6238_v20  ;;  %5099 = vmatprep.mubr.msk.f32.mxu0 %vm289_vm1, %v6418_v8 }
  0xd6   : > { %4900 = vmatmul.mubr.msk.f32.gmra.mrb[28].mxu1 %vm289_vm1, %v6252_v18  ;;  %5100 = vmatmul.mubr.msk.f32.gmra.mrb[28].mxu0 %vm289_vm1, %v6429_v41  ;;  %v6928_v18 = vld [vmem:[#allocation6_spill] sm:$0xff] }
  0xd7   : > { %4902 = vmatprep.mubr.msk.f32.mxu1 %vm289_vm1, %v6258_v16  ;;  %5102 = vmatprep.mubr.msk.f32.mxu0 %vm289_vm1, %v4269_v43  ;;  %v6929_v43 = vld [vmem:[#allocation7_spill] sm:$0xff] }
  0xda   : > { %4903 = vmatmul.mubr.msk.f32.gmra.mrb[30].mxu1 %vm289_vm1, %v6272_v14  ;;  %5103 = vmatmul.mubr.msk.f32.gmra.mrb[30].mxu0 %vm289_vm1, %v4270_v44  ;;  %v6930_v44 = vld [vmem:[#allocation8_spill] sm:$0xff] }
  0xdb   : > { %4907 = vmatprep.mubr.msk.f32.mxu1 %vm289_vm1, %v6925_v46  ;;  %5107 = vmatprep.mubr.msk.f32.mxu0 %vm289_vm1, %v6926_v47 }
  0xde   : > { %4908 = vmatmul.mubr.msk.f32.vlgmr.msra.gmra.mrb[0].mxu1 %vm289_vm1, %v6927_v48  ;;  %5108 = vmatmul.mubr.msk.f32.vlgmr.msra.gmra.mrb[0].mxu0 %vm289_vm1, %v6928_v18  ;;  %v6931_v48 = vld [vmem:[#allocation9_spill] sm:$0xff]  ;;  %v6933_v18 = vld [vmem:[#allocation11_spill] sm:$0xff] }
  0xdf   : > { %5156 = vmatpush3.msk.msra.mxu0 %vm386_vm0, %v6309_v12  ;;  %4910 = vmatprep.mubr.msk.f32.mxu1 %vm289_vm1, %v6009_v50  ;;  %v6932_v12 = vld [vmem:[#allocation10_spill] sm:$0xff]  ;;  %v6934_v50 = vld [vmem:[#allocation12_spill] sm:$0xff] }
  0xe0   : > { %5110 = vmatprep.mubr.msk.f32.mxu0 %vm289_vm1, %v6929_v43 }
  0xe2   : > { %4911 = vmatmul.mubr.msk.f32.gmra.mrb[2].mxu1 %vm289_vm1, %v6029_v52  ;;  %5111 = vmatmul.mubr.msk.f32.gmra.mrb[2].mxu0 %vm289_vm1, %v6930_v44  ;;  %v6935_v52 = vld [vmem:[#allocation13_spill] sm:$0xff]  ;;  %v3793_v44 = vld [vmem:[%s6850_s3 + $0x70] sm:$0xff] }
  0xe3   : > { %4913 = vmatprep.mubr.msk.f32.mxu1 %vm289_vm1, %v6035_v54  ;;  %5113 = vmatprep.mubr.msk.f32.mxu0 %vm289_vm1, %v6931_v48  ;;  %v6936_v54 = vld [vmem:[#allocation14_spill] sm:$0xff]  ;;  %v3794_v48 = vld [vmem:[%s6850_s3 + $0x78] sm:$0xff] }
  0xe6   : > { %4914 = vmatmul.mubr.msk.f32.gmra.mrb[4].mxu1 %vm289_vm1, %v6049_v56  ;;  %5114 = vmatmul.mubr.msk.f32.gmra.mrb[4].mxu0 %vm289_vm1, %v6932_v12  ;;  %v6937_v56 = vld [vmem:[#allocation15_spill] sm:$0xff]  ;;  %v5262_v12 = vpack.c.bf16 %v3794_v48, %v3793_v44 }
  0xe7   : > { %4916 = vmatprep.mubr.msk.f32.mxu1 %vm289_vm1, %v6055_v58  ;;  %5116 = vmatprep.mubr.msk.f32.mxu0 %vm289_vm1, %v6933_v18  ;;  %v6938_v58 = vld [vmem:[#allocation16_spill] sm:$0xff] }
  0xea   : > { %4917 = vmatmul.mubr.msk.f32.gmra.mrb[6].mxu1 %vm289_vm1, %v6069_v60  ;;  %5117 = vmatmul.mubr.msk.f32.gmra.mrb[6].mxu0 %vm289_vm1, %v6934_v50  ;;  %v6939_v60 = vld [vmem:[#allocation17_spill] sm:$0xff] }
  0xeb   : > { %4919 = vmatprep.mubr.msk.f32.mxu1 %vm289_vm1, %v6075_v62  ;;  %5119 = vmatprep.mubr.msk.f32.mxu0 %vm289_vm1, %v6935_v52  ;;  %v6940_v62 = vld [vmem:[#allocation18_spill] sm:$0xff]  ;;  %v5629_v52 = vmov 0.0  }
  0xee   : > { %4920 = vmatmul.mubr.msk.f32.gmra.mrb[8].mxu1 %vm289_vm1, %v6089_v0  ;;  %5120 = vmatmul.mubr.msk.f32.gmra.mrb[8].mxu0 %vm289_vm1, %v6936_v54  ;;  %v6941_v0 = vld [vmem:[#allocation19_spill] sm:$0xff] }
  0xef   : > { %4922 = vmatprep.mubr.msk.f32.mxu1 %vm289_vm1, %v6095_v2  ;;  %5122 = vmatprep.mubr.msk.f32.mxu0 %vm289_vm1, %v6937_v56  ;;  %v6942_v2 = vld [vmem:[#allocation20_spill] sm:$0xff] }
  0xf2   : > { %4923 = vmatmul.mubr.msk.f32.gmra.mrb[10].mxu1 %vm289_vm1, %v6109_v4  ;;  %5123 = vmatmul.mubr.msk.f32.gmra.mrb[10].mxu0 %vm289_vm1, %v6938_v58  ;;  %v6943_v4 = vld [vmem:[#allocation21_spill] sm:$0xff] }
  0xf3   : > { %4925 = vmatprep.mubr.msk.f32.mxu1 %vm289_vm1, %v6115_v6  ;;  %5125 = vmatprep.mubr.msk.f32.mxu0 %vm289_vm1, %v6939_v60  ;;  %v6944_v6 = vld [vmem:[#allocation22_spill] sm:$0xff] }
  0xf6   : > { %4926 = vmatmul.mubr.msk.f32.gmra.mrb[12].mxu1 %vm289_vm1, %v6129_v9  ;;  %5126 = vmatmul.mubr.msk.f32.gmra.mrb[12].mxu0 %vm289_vm1, %v6940_v62  ;;  %v6945_v9 = vld [vmem:[#allocation23_spill] sm:$0xff] }
  0xf7   : > { %4928 = vmatprep.mubr.msk.f32.mxu1 %vm289_vm1, %v6135_v40  ;;  %5128 = vmatprep.mubr.msk.f32.mxu0 %vm289_vm1, %v6941_v0 }
  0xfa   : > { %4929 = vmatmul.mubr.msk.f32.gmra.mrb[14].mxu1 %vm289_vm1, %v6149_v39  ;;  %5129 = vmatmul.mubr.msk.f32.gmra.mrb[14].mxu0 %vm289_vm1, %v6942_v2  ;;  %v6946_v39 = vld [vmem:[#allocation24_spill] sm:$0xff] }
  0xfb   : > { %4931 = vmatprep.mubr.msk.f32.mxu1 %vm289_vm1, %v6155_v37  ;;  %5131 = vmatprep.mubr.msk.f32.mxu0 %vm289_vm1, %v6943_v4  ;;  %v6947_v37 = vld [vmem:[#allocation25_spill] sm:$0xff] }
  0xfe   : > { %4932 = vmatmul.mubr.msk.f32.gmra.mrb[16].mxu1 %vm289_vm1, %v6169_v35  ;;  %5132 = vmatmul.mubr.msk.f32.gmra.mrb[16].mxu0 %vm289_vm1, %v6944_v6  ;;  %v6948_v35 = vld [vmem:[#allocation26_spill] sm:$0xff] }
  0xff   : > { %4934 = vmatprep.mubr.msk.f32.mxu1 %vm289_vm1, %v6175_v33  ;;  %5134 = vmatprep.mubr.msk.f32.mxu0 %vm289_vm1, %v6945_v9  ;;  %v6954_v33 = vld [vmem:[#allocation32_spill] sm:$0xff] }
 0x102   : > { %4935 = vmatmul.mubr.msk.f32.gmra.mrb[18].mxu1 %vm289_vm1, %v6189_v31  ;;  %5135 = vmatmul.mubr.msk.f32.gmra.mrb[18].mxu0 %vm289_vm1, %v6946_v39  ;;  %v6949_v31 = vld [vmem:[#allocation27_spill] sm:$0xff] }
 0x103   : > { %4937 = vmatprep.mubr.msk.f32.mxu1 %vm289_vm1, %v6195_v29  ;;  %5137 = vmatprep.mubr.msk.f32.mxu0 %vm289_vm1, %v6947_v37  ;;  %v6950_v29 = vld [vmem:[#allocation28_spill] sm:$0xff] }
 0x106   : > { %4938 = vmatmul.mubr.msk.f32.gmra.mrb[20].mxu1 %vm289_vm1, %v6209_v27  ;;  %5138 = vmatmul.mubr.msk.f32.gmra.mrb[20].mxu0 %vm289_vm1, %v6948_v35  ;;  %v6951_v27 = vld [vmem:[#allocation29_spill] sm:$0xff] }
 0x107   : > { %4940 = vmatprep.mubr.msk.f32.mxu1 %vm289_vm1, %v6215_v25  ;;  %5140 = vmatprep.mubr.msk.f32.mxu0 %vm289_vm1, %v6949_v31  ;;  %v6952_v25 = vld [vmem:[#allocation30_spill] sm:$0xff] }
 0x10a   : > { %4941 = vmatmul.mubr.msk.f32.gmra.mrb[22].mxu1 %vm289_vm1, %v6229_v23  ;;  %5141 = vmatmul.mubr.msk.f32.gmra.mrb[22].mxu0 %vm289_vm1, %v6950_v29  ;;  %v6953_v23 = vld [vmem:[#allocation31_spill] sm:$0xff] }
 0x10b   : > { %4943 = vmatprep.mubr.msk.f32.mxu1 %vm289_vm1, %v6235_v21  ;;  %5143 = vmatprep.mubr.msk.f32.mxu0 %vm289_vm1, %v6951_v27  ;;  %v6955_v21 = vld [vmem:[#allocation33_spill] sm:$0xff] }
 0x10e   : > { %4944 = vmatmul.mubr.msk.f32.gmra.mrb[24].mxu1 %vm289_vm1, %v6249_v19  ;;  %5144 = vmatmul.mubr.msk.f32.gmra.mrb[24].mxu0 %vm289_vm1, %v6952_v25  ;;  %v4335_v19 = vld [vmem:[%s5732_s17 + $0x199] sm:$0xff] }
 0x10f   : > { %4946 = vmatprep.mubr.msk.f32.mxu1 %vm289_vm1, %v6255_v17  ;;  %5146 = vmatprep.mubr.msk.f32.mxu0 %vm289_vm1, %v6953_v23  ;;  %v6956_v17 = vld [vmem:[#allocation34_spill] sm:$0xff] }
 0x112   : > { %4947 = vmatmul.mubr.msk.f32.gmra.mrb[26].mxu1 %vm289_vm1, %v6269_v15  ;;  %5147 = vmatmul.mubr.msk.f32.gmra.mrb[26].mxu0 %vm289_vm1, %v6954_v33  ;;  %v4336_v15 = vld [vmem:[%s5732_s17 + $0x1a1] sm:$0xff] }
 0x113   : > { %4949 = vmatprep.mubr.msk.f32.mxu1 %vm289_vm1, %v6275_v13  ;;  %5149 = vmatprep.mubr.msk.f32.mxu0 %vm289_vm1, %v6955_v21  ;;  %v6958_v13 = vld [vmem:[#allocation38_spill] sm:$0xff] }
 0x116   : > { %4950 = vmatmul.mubr.msk.f32.gmra.mrb[28].mxu1 %vm289_vm1, %v6289_v11  ;;  %5150 = vmatmul.mubr.msk.f32.gmra.mrb[28].mxu0 %vm289_vm1, %v6956_v17  ;;  %v6957_v11 = vld [vmem:[#allocation37_spill] sm:$0xff] }
 0x117   : > { %4952 = vmatprep.mubr.msk.f32.mxu1 %vm289_vm1, %v6418_v8  ;;  %5152 = vmatprep.mubr.msk.f32.mxu0 %vm289_vm1, %v4335_v19  ;;  %v3791_v8 = vld [vmem:[%s6850_s3 + $0x60] sm:$0xff] }
 0x11a   : > { %4953 = vmatmul.mubr.msk.f32.gmra.mrb[30].mxu1 %vm289_vm1, %v6429_v41  ;;  %5153 = vmatmul.mubr.msk.f32.gmra.mrb[30].mxu0 %vm289_vm1, %v4336_v15  ;;  %v3792_v41 = vld [vmem:[%s6850_s3 + $0x68] sm:$0xff] }
 0x11b   : > { %5157 = vmatprep.mubr.msk.f32.mxu0 %vm289_vm1, %v5981_v45  ;;  %v5259_v46 = vpack.c.bf16 %v3792_v41, %v3791_v8  ;;  %5237 = vmatprep.mubr.msk.f32.mxu1 %vm5628_vm2, %v5629_v52 }
 0x11e   : > { %5158 = vmatmul.mubr.msk.f32.vlgmr.msra.gmra.mrb[0].mxu0 %vm289_vm1, %v6004_v49  ;;  %v3785_v49 = vld [vmem:[%s6850_s3 + $0x30] sm:$0xff] }
 0x11f   : > { %5160 = vmatprep.mubr.msk.f32.mxu0 %vm289_vm1, %v6012_v51  ;;  %v3786_v51 = vld [vmem:[%s6850_s3 + $0x38] sm:$0xff] }
 0x122   : > { %5161 = vmatmul.mubr.msk.f32.gmra.mrb[2].mxu0 %vm289_vm1, %v6032_v53  ;;  %v5250_v53 = vpack.c.bf16 %v3786_v51, %v3785_v49 }
 0x123   : > { %5163 = vmatprep.mubr.msk.f32.mxu0 %vm289_vm1, %v6038_v55  ;;  %v3787_v55 = vld [vmem:[%s6850_s3 + $0x40] sm:$0xff] }
 0x126   : > { %5164 = vmatmul.mubr.msk.f32.gmra.mrb[4].mxu0 %vm289_vm1, %v6052_v57  ;;  %v3788_v57 = vld [vmem:[%s6850_s3 + $0x48] sm:$0xff] }
 0x127   : > { %5166 = vmatprep.mubr.msk.f32.mxu0 %vm289_vm1, %v6058_v59  ;;  %v5253_v59 = vpack.c.bf16 %v3788_v57, %v3787_v55 }
 0x12a   : > { %5167 = vmatmul.mubr.msk.f32.gmra.mrb[6].mxu0 %vm289_vm1, %v6072_v61 }
 0x12b   : > { %5169 = vmatprep.mubr.msk.f32.mxu0 %vm289_vm1, %v6078_v63 }
 0x12e   : > { %5170 = vmatmul.mubr.msk.f32.gmra.mrb[8].mxu0 %vm289_vm1, %v6092_v1  ;;  %v3789_v1 = vld [vmem:[%s6850_s3 + $0x50] sm:$0xff] }
 0x12f   : > { %5172 = vmatprep.mubr.msk.f32.mxu0 %vm289_vm1, %v6098_v3  ;;  %v3790_v3 = vld [vmem:[%s6850_s3 + $0x58] sm:$0xff] }
 0x132   : > { %5173 = vmatmul.mubr.msk.f32.gmra.mrb[10].mxu0 %vm289_vm1, %v6112_v5  ;;  %v5256_v5 = vpack.c.bf16 %v3790_v3, %v3789_v1 }
 0x133   : > { %5175 = vmatprep.mubr.msk.f32.mxu0 %vm289_vm1, %v6118_v7 }
 0x136   : > { %5176 = vmatmul.mubr.msk.f32.gmra.mrb[12].mxu0 %vm289_vm1, %v6132_v10 }
 0x137   : > { %5178 = vmatprep.mubr.msk.f32.mxu0 %vm289_vm1, %v6138_v42 }
 0x13a   : > { %5179 = vmatmul.mubr.msk.f32.gmra.mrb[14].mxu0 %vm289_vm1, %v6152_v38  ;;  %v3784_v38 = vld [vmem:[%s6850_s3 + $0x28] sm:$0xff] }
 0x13b   : > { %5181 = vmatprep.mubr.msk.f32.mxu0 %vm289_vm1, %v6158_v36  ;;  %v3783_v36 = vld [vmem:[%s6850_s3 + $0x20] sm:$0xff] }
 0x13c   : > { %v5247_v45 = vpack.c.bf16 %v3784_v38, %v3783_v36 }
 0x13e   : > { %5182 = vmatmul.mubr.msk.f32.gmra.mrb[16].mxu0 %vm289_vm1, %v6172_v34 }
 0x13f   : > { %5184 = vmatprep.mubr.msk.f32.mxu0 %vm289_vm1, %v6178_v32  ;;  %v3782_v32 = vld [vmem:[%s6850_s3 + $0x18] sm:$0xff] }
 0x142   : > { %5185 = vmatmul.mubr.msk.f32.gmra.mrb[18].mxu0 %vm289_vm1, %v6192_v30  ;;  %v3781_v30 = vld [vmem:[%s6850_s3 + $0x10] sm:$0xff] }
 0x143   : > { %5187 = vmatprep.mubr.msk.f32.mxu0 %vm289_vm1, %v6198_v28  ;;  %v5244_v34 = vpack.c.bf16 %v3782_v32, %v3781_v30 }
 0x146   : > { %5188 = vmatmul.mubr.msk.f32.gmra.mrb[20].mxu0 %vm289_vm1, %v6212_v26  ;;  %v4401_v26 = vld [vmem:[%s5732_s17 + $0x19a] sm:$0xff] }
 0x147   : > { %5190 = vmatprep.mubr.msk.f32.mxu0 %vm289_vm1, %v6218_v24  ;;  %v6959_v24 = vld [vmem:[#allocation39_spill] sm:$0xff] }
 0x14a   : > { %5191 = vmatmul.mubr.msk.f32.gmra.mrb[22].mxu0 %vm289_vm1, %v6232_v22  ;;  %v4402_v22 = vld [vmem:[%s5732_s17 + $0x1a2] sm:$0xff]  ;;  %s216_s17 = scalar_lea.vmem [#allocation2], %s215_s14 }
 0x14b   : > { %5193 = vmatprep.mubr.msk.f32.mxu0 %vm289_vm1, %v6238_v20  ;;  %v5627_v20 = vmov 0.0|0.0   ;;  %s3880_s25 = sshll.u32 %s216_s17, 4  ;;  %s6807_s25 = int_to_ptr.vmem [resolvable:$true] %s3880_s25 }
 0x14c   : > { %5240 = vmatprep.subr.bf16.mxu1 %v5627_v20  ;;  %s5563_s8 = scalar_lea.vmem %s6807_s25, 16  ;;  %p5570_p0 = scmp.lt.s32.totalorder %s6807_s25, %s5568_s9 }
 0x14d   : > { %p5564_p11 = scmp.ne.s32.totalorder %s6807_s25, %s5563_s8  ;;  %p5571_p1 = scmp.lt.s32.totalorder %s5569_s10, %s5563_s8 }
 0x14e   : > { %5194 = vmatmul.mubr.msk.f32.gmra.mrb[24].mxu0 %vm289_vm1, %v6957_v11  ;;  %v6738_v11 = vld [vmem:[%s6849_s2] ss:$0 sm:$0xff] }
 0x14f   : > { %5196 = vmatprep.mubr.msk.f32.mxu0 %vm289_vm1, %v6258_v16  ;;  %v3779_v16 = vld [vmem:[%s6850_s3] sm:$0xff]  ;;  %p5565_p12 = pnand %p5564_p11, %p5699_p5  ;;  %p5572_p2 = por %p5571_p1, %p5570_p0 }
 0x151   : > { %p5566_p13 = pneg %p5565_p12 }
 0x152   : > { %5197 = vmatmul.mubr.msk.f32.gmra.mrb[26].mxu0 %vm289_vm1, %v6272_v14  ;;  %v3780_v14 = vld [vmem:[%s6850_s3 + $0x8] sm:$0xff] }
 0x153   : > { %5199 = vmatprep.mubr.msk.f32.mxu0 %vm289_vm1, %v6958_v13  ;;  %v5241_v28 = vpack.c.bf16 %v3780_v14, %v3779_v16  ;;  %p5573_p3 = pnand %p5572_p2, %p5566_p13 }
 0x155   : > { %5242 = vmatpush3.bf16.msra.mxu1 %v5241_v28 }
 0x156   : > { %5200 = vmatmul.mubr.msk.f32.gmra.mrb[28].mxu0 %vm289_vm1, %v6959_v24  ;;  %5243 = vmatprep.subr.bf16.mxu1 %v5627_v20 }
 0x157   : > { %5202 = vmatprep.mubr.msk.f32.mxu0 %vm289_vm1, %v4401_v26 }
 0x159   : > { %5245 = vmatpush3.bf16.msra.mxu1 %v5244_v34 }
 0x15a   : > { %5203 = vmatmul.mubr.msk.f32.gmra.mrb[30].mxu0 %vm289_vm1, %v4402_v22  ;;  %5246 = vmatprep.subr.bf16.mxu1 %v5627_v20 }
 0x15d   : > { %5248 = vmatpush3.bf16.msra.mxu1 %v5247_v45 }
 0x15e   : > { %5249 = vmatprep.subr.bf16.mxu1 %v5627_v20 }
 0x161   : > { %5251 = vmatpush3.bf16.msra.mxu1 %v5250_v53 }
 0x162   : > { %5252 = vmatprep.subr.bf16.mxu1 %v5627_v20 }
 0x165   : > { %5254 = vmatpush3.bf16.msra.mxu1 %v5253_v59 }
 0x166   : > { %5255 = vmatprep.subr.bf16.mxu1 %v5627_v20 }
 0x169   : > { %5257 = vmatpush3.bf16.msra.mxu1 %v5256_v5 }
 0x16a   : > { %5258 = vmatprep.subr.bf16.mxu1 %v5627_v20 }
 0x16d   : > { %5260 = vmatpush3.bf16.msra.mxu1 %v5259_v46 }
 0x16e   : > { %5261 = vmatprep.subr.bf16.mxu1 %v5627_v20 }
 0x171   : > { %5263 = vmatpush3.bf16.msra.mxu1 %v5262_v12 }
 0x1b1   : > { %v4909_v61 = vpop.f32.mrb[0].mxu1 }
 0x1b2   : > { %v1529_v63 = vpop.f32.mrb[1].mxu1 }
 0x1b5   : > { %v4912_v7 = vpop.f32.mrb[2].mxu1 }
 0x1b6   : > { %v1539_v10 = vpop.f32.mrb[3].mxu1 }
 0x1b9   : > { %v4915_v40 = vpop.f32.mrb[4].mxu1 }
 0x1ba   : > { %v1549_v42 = vpop.f32.mrb[5].mxu1 }
 0x1bd   : > { %v4918_v47 = vpop.f32.mrb[6].mxu1 }
 0x1be   : > { %v6679_v43 = vpop.f32.mrb[7].mxu1 }
 0x1c1   : > { %v6687_v18 = vpop.f32.mrb[8].mxu1 }
 0x1c2   : > { %v6689_v50 = vpop.f32.mrb[9].mxu1 }
 0x1c5   : > { %v6691_v54 = vpop.f32.mrb[10].mxu1 }
 0x1c6   : > { %v6693_v56 = vpop.f32.mrb[11].mxu1 }
 0x1c9   : > { %v6695_v58 = vpop.f32.mrb[12].mxu1 }
 0x1ca   : > { %v6697_v60 = vpop.f32.mrb[13].mxu1 }
 0x1cd   : > { %v6699_v62 = vpop.f32.mrb[14].mxu1 }
 0x1ce   : > { %v6701_v0 = vpop.f32.mrb[15].mxu1 }
 0x1d1   : > { %v6703_v2 = vpop.f32.mrb[16].mxu1 }
 0x1d2   : > { %v6705_v4 = vpop.f32.mrb[17].mxu1 }
 0x1d5   : > { %v6707_v6 = vpop.f32.mrb[18].mxu1 }
 0x1d6   : > { %v6709_v9 = vpop.f32.mrb[19].mxu1 }
 0x1d9   : > { %v6711_v39 = vpop.f32.mrb[20].mxu1 }
 0x1da   : > { %v6713_v37 = vpop.f32.mrb[21].mxu1 }
 0x1dd   : > { %v6715_v35 = vpop.f32.mrb[22].mxu1 }
 0x1de   : > { %v6717_v31 = vpop.f32.mrb[23].mxu1 }
 0x1e1   : > { %v6719_v29 = vpop.f32.mrb[24].mxu1 }
 0x1e2   : > { %v6721_v27 = vpop.f32.mrb[25].mxu1 }
 0x1e5   : > { %v6723_v25 = vpop.f32.mrb[26].mxu1 }
 0x1e6   : > { %v6725_v23 = vpop.f32.mrb[27].mxu1 }
 0x1e9   : > { %v6727_v33 = vpop.f32.mrb[28].mxu1 }
 0x1ea   : > { %v6729_v21 = vpop.f32.mrb[29].mxu1 }
 0x1ed   : > { %v6731_v19 = vpop.f32.mrb[30].mxu1 }
 0x1ee   : > { %v6733_v17 = vpop.f32.mrb[31].mxu1 }
 0x1f1   : > { %v5159_v15 = vpop.f32.mrb[0].mxu0 }
 0x1f2   : > { %v5264_v13 = vadd.f32 %v5159_v15, %v4909_v61  ;;  %v3480_v26 = vpop.f32.mrb[1].mxu0 }
 0x1f3   : > { %v5265_v24 = vadd.f32 %v3480_v26, %v1529_v63 }
 0x1f4   : > { %v3679_v22 = vadd.f32 %v5264_v13, %v6738_v11 }
 0x1f5   : > { %v3678_v20 = vadd.f32 %v5265_v24, %v6738_v11  ;;  %v5162_v16 = vpop.f32.mrb[2].mxu0 }
 0x1f6   : > { %v3711_v14 = vmax.f32 %v3679_v22, 0.0  ;;  %v5266_v28 = vadd.f32 %v5162_v16, %v4912_v7  ;;  %v3490_v30 = vpop.f32.mrb[3].mxu0 }
 0x1f7   : > { %v3710_v32 = vmax.f32 %v3678_v20, 0.0  ;;  %v5267_v34 = vadd.f32 %v3490_v30, %v1539_v10 }
 0x1f8   : > { %v3681_v38 = vadd.f32 %v5266_v28, %v6738_v11 }
 0x1f9   : > { %v3742_v36 = vadd.f32 %v3711_v14, %v3710_v32  ;;  %v3680_v45 = vadd.f32 %v5267_v34, %v6738_v11  ;;  %v5165_v49 = vpop.f32.mrb[4].mxu0 }
 0x1fa   : > { %v5268_v51 = vadd.f32 %v5165_v49, %v4915_v40  ;;  %v3500_v53 = vpop.f32.mrb[5].mxu0  ;;  %v3713_v59 = vmax.f32 %v3681_v38, 0.0 }
 0x1fb   : > { %v3712_v55 = vmax.f32 %v3680_v45, 0.0  ;;  %v5269_v57 = vadd.f32 %v3500_v53, %v1549_v42 }
 0x1fc   : > { %v3683_v63 = vadd.f32 %v5268_v51, %v6738_v11 }
 0x1fd   : > { %v3743_v61 = vadd.f32 %v3742_v36, %v3712_v55  ;;  %v3682_v1 = vadd.f32 %v5269_v57, %v6738_v11  ;;  %v5168_v3 = vpop.f32.mrb[6].mxu0 }
 0x1fe   : > { %v5270_v5 = vadd.f32 %v5168_v3, %v4918_v47  ;;  %v3510_v7 = vpop.f32.mrb[7].mxu0  ;;  %v3715_v46 = vmax.f32 %v3683_v63, 0.0 }
 0x1ff   : > { %v3714_v10 = vmax.f32 %v3682_v1, 0.0  ;;  %v3744_v8 = vadd.f32 %v3743_v61, %v3713_v59  ;;  %v5271_v41 = vadd.f32 %v3510_v7, %v6679_v43 }
 0x200   : > { %v3685_v40 = vadd.f32 %v5270_v5, %v6738_v11 }
 0x201   : > { %v3745_v44 = vadd.f32 %v3744_v8, %v3714_v10  ;;  %v3684_v48 = vadd.f32 %v5271_v41, %v6738_v11  ;;  %v5171_v42 = vpop.f32.mrb[8].mxu0 }
 0x202   : > { %v5272_v12 = vadd.f32 %v5171_v42, %v6687_v18  ;;  %v3520_v52 = vpop.f32.mrb[9].mxu0  ;;  %v3717_v47 = vmax.f32 %v3685_v40, 0.0 }
 0x203   : > { %v3716_v15 = vmax.f32 %v3684_v48, 0.0  ;;  %v3746_v13 = vadd.f32 %v3745_v44, %v3715_v46  ;;  %v5273_v26 = vadd.f32 %v3520_v52, %v6689_v50 }
 0x204   : > { %v3687_v22 = vadd.f32 %v5272_v12, %v6738_v11 }
 0x205   : > { %v3747_v24 = vadd.f32 %v3746_v13, %v3716_v15  ;;  %v3686_v43 = vadd.f32 %v5273_v26, %v6738_v11  ;;  %v5174_v20 = vpop.f32.mrb[10].mxu0 }
 0x206   : > { %v5274_v16 = vadd.f32 %v5174_v20, %v6691_v54  ;;  %v3530_v14 = vpop.f32.mrb[11].mxu0  ;;  %v3719_v18 = vmax.f32 %v3687_v22, 0.0 }
 0x207   : > { %v3718_v28 = vmax.f32 %v3686_v43, 0.0  ;;  %v3748_v30 = vadd.f32 %v3747_v24, %v3717_v47  ;;  %v5275_v32 = vadd.f32 %v3530_v14, %v6693_v56 }
 0x208   : > { %v3689_v36 = vadd.f32 %v5274_v16, %v6738_v11 }
 0x209   : > { %v3749_v34 = vadd.f32 %v3748_v30, %v3718_v28  ;;  %v3688_v50 = vadd.f32 %v5275_v32, %v6738_v11  ;;  %v5177_v38 = vpop.f32.mrb[12].mxu0 }
 0x20a   : > { %v5276_v45 = vadd.f32 %v5177_v38, %v6695_v58  ;;  %v3540_v49 = vpop.f32.mrb[13].mxu0  ;;  %v3721_v54 = vmax.f32 %v3689_v36, 0.0 }
 0x20b   : > { %v3720_v51 = vmax.f32 %v3688_v50, 0.0  ;;  %v3750_v53 = vadd.f32 %v3749_v34, %v3719_v18  ;;  %v5277_v55 = vadd.f32 %v3540_v49, %v6697_v60 }
 0x20c   : > { %v3691_v59 = vadd.f32 %v5276_v45, %v6738_v11 }
 0x20d   : > { %v3751_v57 = vadd.f32 %v3750_v53, %v3720_v51  ;;  %v3690_v56 = vadd.f32 %v5277_v55, %v6738_v11  ;;  %v5180_v61 = vpop.f32.mrb[14].mxu0 }
 0x20e   : > { %v5278_v63 = vadd.f32 %v5180_v61, %v6699_v62  ;;  %v3550_v1 = vpop.f32.mrb[15].mxu0  ;;  %v3723_v58 = vmax.f32 %v3691_v59, 0.0 }
 0x20f   : > { %v3722_v3 = vmax.f32 %v3690_v56, 0.0  ;;  %v3752_v5 = vadd.f32 %v3751_v57, %v3721_v54  ;;  %v5279_v7 = vadd.f32 %v3550_v1, %v6701_v0 }
 0x210   : > { %v3693_v8 = vadd.f32 %v5278_v63, %v6738_v11 }
 0x211   : > { %v3753_v10 = vadd.f32 %v3752_v5, %v3722_v3  ;;  %v3692_v60 = vadd.f32 %v5279_v7, %v6738_v11  ;;  %v5183_v41 = vpop.f32.mrb[16].mxu0 }
 0x212   : > { %v5280_v46 = vadd.f32 %v5183_v41, %v6703_v2  ;;  %v3560_v44 = vpop.f32.mrb[17].mxu0  ;;  %v3725_v62 = vmax.f32 %v3693_v8, 0.0 }
 0x213   : > { %v3724_v40 = vmax.f32 %v3692_v60, 0.0  ;;  %v3754_v48 = vadd.f32 %v3753_v10, %v3723_v58  ;;  %v5281_v42 = vadd.f32 %v3560_v44, %v6705_v4 }
 0x214   : > { %v3695_v52 = vadd.f32 %v5280_v46, %v6738_v11 }
 0x215   : > { %v3755_v12 = vadd.f32 %v3754_v48, %v3724_v40  ;;  %v3694_v0 = vadd.f32 %v5281_v42, %v6738_v11  ;;  %v5186_v15 = vpop.f32.mrb[18].mxu0 }
 0x216   : > { %v5282_v13 = vadd.f32 %v5186_v15, %v6707_v6  ;;  %v3570_v26 = vpop.f32.mrb[19].mxu0  ;;  %v3727_v2 = vmax.f32 %v3695_v52, 0.0 }
 0x217   : > { %v3726_v47 = vmax.f32 %v3694_v0, 0.0  ;;  %v3756_v24 = vadd.f32 %v3755_v12, %v3725_v62  ;;  %v5283_v22 = vadd.f32 %v3570_v26, %v6709_v9 }
 0x218   : > { %v3697_v20 = vadd.f32 %v5282_v13, %v6738_v11 }
 0x219   : > { %v3757_v43 = vadd.f32 %v3756_v24, %v3726_v47  ;;  %v3696_v4 = vadd.f32 %v5283_v22, %v6738_v11  ;;  %v5189_v16 = vpop.f32.mrb[20].mxu0 }
 0x21a   : > { %v5284_v14 = vadd.f32 %v5189_v16, %v6711_v39  ;;  %v3580_v28 = vpop.f32.mrb[21].mxu0  ;;  %v3729_v6 = vmax.f32 %v3697_v20, 0.0 }
 0x21b   : > { %v3728_v30 = vmax.f32 %v3696_v4, 0.0  ;;  %v3758_v32 = vadd.f32 %v3757_v43, %v3727_v2  ;;  %v5285_v18 = vadd.f32 %v3580_v28, %v6713_v37 }
 0x21c   : > { %v3699_v36 = vadd.f32 %v5284_v14, %v6738_v11 }
 0x21d   : > { %v3759_v34 = vadd.f32 %v3758_v32, %v3728_v30  ;;  %v3698_v9 = vadd.f32 %v5285_v18, %v6738_v11  ;;  %v5192_v50 = vpop.f32.mrb[22].mxu0 }
 0x21e   : > { %v5286_v38 = vadd.f32 %v5192_v50, %v6715_v35  ;;  %v3590_v45 = vpop.f32.mrb[23].mxu0  ;;  %v3731_v39 = vmax.f32 %v3699_v36, 0.0 }
 0x21f   : > { %v3730_v49 = vmax.f32 %v3698_v9, 0.0  ;;  %v3760_v51 = vadd.f32 %v3759_v34, %v3729_v6  ;;  %v5287_v53 = vadd.f32 %v3590_v45, %v6717_v31 }
 0x220   : > { %v3701_v54 = vadd.f32 %v5286_v38, %v6738_v11 }
 0x221   : > { %v3761_v55 = vadd.f32 %v3760_v51, %v3730_v49  ;;  %v3700_v37 = vadd.f32 %v5287_v53, %v6738_v11  ;;  %v5195_v57 = vpop.f32.mrb[24].mxu0 }
 0x222   : > { %v5288_v59 = vadd.f32 %v5195_v57, %v6719_v29  ;;  %v3600_v56 = vpop.f32.mrb[25].mxu0  ;;  %v3733_v35 = vmax.f32 %v3701_v54, 0.0 }
 0x223   : > { %v3732_v61 = vmax.f32 %v3700_v37, 0.0  ;;  %v3762_v63 = vadd.f32 %v3761_v55, %v3731_v39  ;;  %v5289_v1 = vadd.f32 %v3600_v56, %v6721_v27 }
 0x224   : > { %v3703_v5 = vadd.f32 %v5288_v59, %v6738_v11 }
 0x225   : > { %v3763_v3 = vadd.f32 %v3762_v63, %v3732_v61  ;;  %v3702_v31 = vadd.f32 %v5289_v1, %v6738_v11  ;;  %v5198_v7 = vpop.f32.mrb[26].mxu0 }
 0x226   : > { %v5290_v58 = vadd.f32 %v5198_v7, %v6723_v25  ;;  %v3610_v10 = vpop.f32.mrb[27].mxu0  ;;  %v3735_v29 = vmax.f32 %v3703_v5, 0.0 }
 0x227   : > { %v3734_v8 = vmax.f32 %v3702_v31, 0.0  ;;  %v3764_v60 = vadd.f32 %v3763_v3, %v3733_v35  ;;  %v5291_v41 = vadd.f32 %v3610_v10, %v6725_v23 }
 0x228   : > { %v3705_v44 = vadd.f32 %v5290_v58, %v6738_v11 }
 0x229   : > { %v3765_v46 = vadd.f32 %v3764_v60, %v3734_v8  ;;  %v3704_v27 = vadd.f32 %v5291_v41, %v6738_v11  ;;  %v5201_v40 = vpop.f32.mrb[28].mxu0 }
 0x22a   : > { %v5292_v48 = vadd.f32 %v5201_v40, %v6727_v33  ;;  %v3620_v42 = vpop.f32.mrb[29].mxu0  ;;  %v3737_v25 = vmax.f32 %v3705_v44, 0.0 }
 0x22b   : > { %v3736_v62 = vmax.f32 %v3704_v27, 0.0  ;;  %v3766_v12 = vadd.f32 %v3765_v46, %v3735_v29  ;;  %v5293_v52 = vadd.f32 %v3620_v42, %v6729_v21 }
 0x22c   : > { %v3707_v15 = vadd.f32 %v5292_v48, %v6738_v11 }
 0x22d   : > { %v3767_v0 = vadd.f32 %v3766_v12, %v3736_v62  ;;  %v3706_v23 = vadd.f32 %v5293_v52, %v6738_v11  ;;  %v5204_v13 = vpop.f32.mrb[30].mxu0 }
 0x22e   : > { %v5294_v26 = vadd.f32 %v5204_v13, %v6731_v19  ;;  %v3630_v47 = vpop.f32.mrb[31].mxu0  ;;  %v3739_v33 = vmax.f32 %v3707_v15, 0.0 }
 0x22f   : > { %v3738_v24 = vmax.f32 %v3706_v23, 0.0  ;;  %v3768_v22 = vadd.f32 %v3767_v0, %v3737_v25  ;;  %v5295_v2 = vadd.f32 %v3630_v47, %v6733_v17  ;;  %v3795_v17 = vld [vmem:[%s6851_s4] sm:$0x1] }
 0x230   : > { %v3709_v20 = vadd.f32 %v5294_v26, %v6738_v11 }
 0x231   : > { %v3769_v43 = vadd.f32 %v3768_v22, %v3738_v24  ;;  %v3708_v21 = vadd.f32 %v5295_v2, %v6738_v11 }
 0x232   : > { %v3741_v14 = vmax.f32 %v3709_v20, 0.0 }
 0x233   : > { %v3740_v4 = vmax.f32 %v3708_v21, 0.0  ;;  %v3770_v16 = vadd.f32 %v3769_v43, %v3739_v33 }
 0x235   : > { %v3771_v28 = vadd.f32 %v3770_v16, %v3740_v4 }
 0x237   : > { %v3772_v30 = vadd.f32 %v3771_v28, %v3741_v14 }
 0x239   : > { %v3773_v32 = vrot.slane %v3772_v30, 4 }
 0x23b   : > { %v3774_v19 = vadd.f32 %v3773_v32, %v3772_v30 }
 0x23d   : > { %v3775_v18 = vrot.slane %v3774_v19, 2 }
 0x23f   : > { %v3776_v6 = vadd.f32 %v3775_v18, %v3774_v19 }
 0x241   : > { %v3777_v34 = vrot.slane %v3776_v6, 1 }
 0x243   : > { %v3778_v36 = vadd.f32 %v3777_v34, %v3776_v6 }
 0x245   : > { %5238 = vmatmul.mubr.f32.vlgmr.msra.gmra.mrb[32].mxu1 %v3778_v36 }
 0x318   : > { %v3862_v11 = vpop.f32.mrb[32].mxu1 }
 0x319   : > { %v3863_v9 = vadd.f32 %v3862_v11, %v3795_v17  ;;  %v5239_v50 = vpop.f32.mrb[33].mxu1 }
 0x31b   : > { %3866 = vst [vmem:[%s216_s17] sm:$0x1] %v3863_v9 }
 0x31c   : > { %5576 = shalt.err (!%p5573_p3)
}
 0x31d   : > { %s5577_s11 = scalar_lea.hbm %s6805_s6, 16  ;;  %s5581_s14 = scalar_lea.hbm %s6852_s5, 32 }
 0x31e   : > { %p5578_p4 = scmp.ne.s32.totalorder %s6805_s6, %s5577_s11  ;;  %p5582_p9 = scmp.lt.u32.totalorder %s6805_s6, %s6852_s5 }
 0x31f   : > { %p5583_p10 = scmp.lt.u32.totalorder %s5581_s14, %s5577_s11  ;;  %p5585_p12 = scmp.lt.u32.totalorder %s5577_s11, %s6805_s6 }
 0x320   : > { %p5579_p7 = pnand %p5578_p4, %p5699_p5 }
 0x321   : > { %p5584_p11 = por %p5583_p10, %p5582_p9 }
 0x322   : > { %p5580_p8 = pneg %p5579_p7 }
 0x323   : > { %p5586_p13 = por %p5585_p12, %p5584_p11 }
 0x325   : > { %p5587_p0 = pnand %p5586_p13, %p5580_p8 }
 0x327   : > { %5590 = shalt.err (!%p5587_p0)
}
 0x328   : > { %5521 = dma.vmem_to_hbm [thread:$0]  (%p5699_p5), %s6807_s25, 16, %s6805_s6, %s3868_s7  }
 0x329 PF: > { %p5527_p1 = scmp.ge.s32.totalorder %s5625_s21, 2  ;;  %s3892_s23 = sand.u32 1, %s5613_s18  }
 0x32a   : > { %s3893_s17 = scalar_lea.sflag [#allocation3], %s3892_s23 }
 0x32b   : > { %p5524_p2 = pnand %p5527_p1, %p5703_p6 }
 0x32d   : > { %5608 = dma.done.wait (!%p5524_p2), %s3893_s17, 16  }
 0x32e   : > { %5610 = vsyncadd (!%p5524_p2), %s3893_s17, 4294967280  ;;  %p15_p3 = scmp.ge.s32.totalorder %s5686_s24, 4   ;;  %s6960_s18 = smov %s5617_s19 }
 0x32f   : > { %s6961_s19 = smov %s5621_s20  ;;  %s6962_s20 = smov %s5697_s27 }
 0x330   : > { %s6963_s21 = smov %s5686_s24  ;;  %17 = sbr.rel (!%p15_p3) target bundleno = 3 (0x3), region = 85 }
 0x337   :  { %3897 = vsyncpa [#allocation3], 1 }
 0x338   :  { %3899 = vsyncpa [#allocation3 + $0x1], 1 }

</bundles_post_ra>
